<compile_context>
chip_gen: v5e
topology: v5e:2x2
jax: 0.10.0
libtpu: 0.0.40
codegen_flags: <defaults>
</compile_context>

<pallas_src>
import jax
import jax.numpy as jnp
from jax.experimental import pallas as pl
from jax.experimental.pallas import tpu as pltpu

# ----- synthetic "programs" vocabulary (AllenNLP convention) ----------------
PAD_INDEX = 0      # @@PADDING@@
UNK_INDEX = 1      # @@UNKNOWN@@
START_INDEX = 2    # @start@
END_INDEX = 3      # @end@

VOCAB_SIZE = 32
INPUT_SIZE = 32    # embedding / projection dim (module default 256, scaled down)
HIDDEN_SIZE = 32   # LSTM hidden size        (module default 128, scaled down)
NUM_LAYERS = 2

# TODO(synk): the Average()/perplexity metric accumulation is host-side
# training state with no kernel equivalent; only forward() is implemented.


# ============================================================================
# Fused kernel: embedding (one-hot @ table) -> 2-layer LSTM (layer-by-layer,
# unrolled in-kernel time loops, hoisted input-gate matmuls) -> single fused
# output-head matmul -> softmax + NLL + masked categorical sampling (inverse
# CDF).  Everything stays resident in VMEM / vregs; no scratch buffers.
# ============================================================================
def _build_kernel(batch, t2, hidden):
    def kernel(tok_ref, tgt_ref, unif_ref, emb_ref, wih0_ref, whh0_ref,
               b0_ref, wih1_ref, whh1_ref, b1_ref, wout_ref, keep_ref,
               tril_ref, pred_ref, nll_ref):
        n = tok_ref.shape[0]          # batch * t2 (t-major rows)
        v = emb_ref.shape[0]
        f32 = jnp.float32
        bf16 = jnp.bfloat16

        # ---- embedding for ALL positions at once: one-hot @ table (bf16 MXU)
        class_iota = jax.lax.broadcasted_iota(jnp.int32, (n, v), 1)
        onehot = (class_iota == tok_ref[...]).astype(bf16)                 # (N, V)
        x_all = jnp.dot(onehot, emb_ref[...], preferred_element_type=f32)  # (N, D)

        # ---- layer-0 input gates for all timesteps, hoisted out of the loop
        gx0 = jnp.dot(x_all.astype(bf16), wih0_ref[...],
                      preferred_element_type=f32) + b0_ref[...]            # (N, 4H)

        whh0 = whh0_ref[...]          # (H, 4H) bf16
        whh1 = whh1_ref[...]          # (H, 4H) bf16

        def gates_to_hc(gates, c_prev):
            # full-width nonlinearities (one sigmoid + one tanh over (B, 4H)),
            # then static lane slices for the i/f/g/o gates.
            sg = jax.nn.sigmoid(gates)
            tg = jnp.tanh(gates)
            i = sg[:, 0 * hidden:1 * hidden]
            f = sg[:, 1 * hidden:2 * hidden]
            g = tg[:, 2 * hidden:3 * hidden]
            o = sg[:, 3 * hidden:4 * hidden]
            c_new = f * c_prev + i * g
            h_new = o * jnp.tanh(c_new)
            return h_new, c_new

        # ---- layer-0 recurrence (fully unrolled; t2 small & static) --------
        h0 = jnp.zeros((batch, hidden), f32)
        c0 = jnp.zeros((batch, hidden), f32)
        h0_steps = []
        for t in range(t2):
            g0 = gx0[t * batch:(t + 1) * batch, :] + jnp.dot(
                h0.astype(bf16), whh0, preferred_element_type=f32)
            h0, c0 = gates_to_hc(g0, c0)
            h0_steps.append(h0)
        h0_all = jnp.concatenate(h0_steps, axis=0)                         # (N, H)

        # ---- layer-1 input gates hoisted as one batched matmul -------------
        gx1 = jnp.dot(h0_all.astype(bf16), wih1_ref[...],
                      preferred_element_type=f32) + b1_ref[...]            # (N, 4H)

        # ---- layer-1 recurrence (only h1 @ W_hh1 per step) ------------------
        h1 = jnp.zeros((batch, hidden), f32)
        c1 = jnp.zeros((batch, hidden), f32)
        h1_steps = []
        for t in range(t2):
            g1 = gx1[t * batch:(t + 1) * batch, :] + jnp.dot(
                h1.astype(bf16), whh1, preferred_element_type=f32)
            h1, c1 = gates_to_hc(g1, c1)
            h1_steps.append(h1)
        enc = jnp.concatenate(h1_steps, axis=0)                            # (N, H)

        # NOTE: PytorchSeq2SeqWrapper zero-pads encoder outputs beyond sequence
        # lengths; those positions only feed predictions/loss terms that are
        # multiplied by a zero mask downstream, so skipping the zeroing here is
        # exactly output-equivalent (and saves a masked multiply pass).

        # ---- fused output head (W_out = W_proj^T @ Emb^T precomputed) ------
        logits = jnp.dot(enc.astype(bf16), wout_ref[...],
                         preferred_element_type=f32)                       # (N, V)

        m = jnp.max(logits, axis=-1, keepdims=True)
        z = logits - m
        ez = jnp.exp(z)
        denom = jnp.sum(ez, axis=-1, keepdims=True)
        lse = jnp.log(denom)                                  # exact, for the loss

        tgt = tgt_ref[...]                                                 # (N, 1)
        z_tgt = jnp.sum(jnp.where(class_iota == tgt, z, 0.0),
                        axis=-1, keepdims=True)
        nll_ref[...] = lse - z_tgt                            # -log_softmax[target]

        # sampling path: approx reciprocal is fine (only perturbs the threshold)
        probs = ez * pl.reciprocal(denom, approx=True)
        p = probs * keep_ref[...]                 # zero out START / PAD / UNK cols
        total = jnp.sum(p, axis=-1, keepdims=True)
        # clamp u away from 0 so a zero-probability (banned) token can never be
        # selected; clamp the index below V for float-rounding safety.
        thresh = jnp.maximum(unif_ref[...], 1e-6) * total
        cdf = jnp.dot(p, tril_ref[...], preferred_element_type=f32)        # (N, V)
        pred = jnp.sum((cdf < thresh).astype(jnp.int32), axis=-1, keepdims=True)
        pred_ref[...] = jnp.minimum(pred, v - 1)

    return kernel


def run_program_prior_kernel(tok_col, tgt_col, unif_col, params, batch, t2):
    n = tok_col.shape[0]
    vmem = pl.BlockSpec(memory_space=pltpu.MemorySpace.VMEM)
    kernel = _build_kernel(batch, t2, HIDDEN_SIZE)
    return pl.pallas_call(
        kernel,
        out_shape=(jax.ShapeDtypeStruct((n, 1), jnp.int32),
                   jax.ShapeDtypeStruct((n, 1), jnp.float32)),
        in_specs=[vmem] * 13,
        out_specs=(vmem, vmem),
    )(tok_col, tgt_col, unif_col,
      params["emb"], params["wih0"], params["whh0"], params["b0"],
      params["wih1"], params["whh1"], params["b1"],
      params["w_out"], params["keep_mask"], params["tril"])


# ============================================================================
# Forward pass: tiny integer boundary-token prep in the wrapper, then ONE
# fused Pallas kernel, then tiny masking / loss reduction on (B, T2) tensors.
# ============================================================================
def program_prior_forward(program_tokens, params, sample_key):
    b, l = program_tokens.shape
    t2 = l + 2
    n = b * t2

    # -- add_sentence_boundary_token_ids --
    in_mask = (program_tokens != PAD_INDEX)
    lengths = in_mask.sum(-1)
    ext = jnp.zeros((b, t2), jnp.int32)
    ext = ext.at[:, 1:l + 1].set(program_tokens.astype(jnp.int32))
    ext = ext.at[:, 0].set(START_INDEX)
    pos = jnp.arange(t2)[None, :]
    ext = jnp.where(pos == (lengths + 1)[:, None], END_INDEX, ext)

    mask = (ext != PAD_INDEX).astype(jnp.int32)               # (B, T2)

    # next-step targets (teacher forcing); last position targets PAD (weight 0)
    targets = jnp.concatenate(
        [ext[:, 1:], jnp.full((b, 1), PAD_INDEX, jnp.int32)], axis=1)

    # t-major flattening (time on the leading axis) for the fused kernel
    tok_col = ext.T.reshape(n, 1)
    tgt_col = targets.T.reshape(n, 1)
    unif_col = jax.random.uniform(sample_key, (n, 1), jnp.float32)

    pred_col, nll_col = run_program_prior_kernel(
        tok_col, tgt_col, unif_col, params, b, t2)

    preds = pred_col.reshape(t2, b).T                         # (B, T2)
    nll = nll_col.reshape(t2, b).T                            # (B, T2)

    # predictions[:, :-1] * mask[:, 1:]
    predictions = preds[:, :-1] * mask[:, 1:]
    # sequence_cross_entropy_with_logits(..., average=None)
    weights = mask[:, 1:].astype(jnp.float32)
    loss = jnp.sum(nll[:, :-1] * weights, axis=-1) / (
        jnp.sum(weights, axis=-1) + 1e-13)
    return {"predictions": predictions, "loss": loss}


# ============================================================================
# Deterministic parameter init (synthetic weights, no checkpoint).
# Weights used as MXU operands are stored in bf16; biases / masks stay f32.
# ============================================================================
def init_params(key):
    ks = jax.random.split(key, 10)
    emb = 0.1 * jax.random.normal(ks[0], (VOCAB_SIZE, INPUT_SIZE), jnp.float32)
    emb = emb.at[PAD_INDEX].set(0.0)   # nn.Embedding padding_idx convention

    scale = 1.0 / jnp.sqrt(HIDDEN_SIZE)

    def unif(k, shape):
        return jax.random.uniform(k, shape, jnp.float32, -scale, scale)

    w_ih0 = unif(ks[1], (4 * HIDDEN_SIZE, INPUT_SIZE))
    w_hh0 = unif(ks[2], (4 * HIDDEN_SIZE, HIDDEN_SIZE))
    b_ih0 = unif(ks[3], (4 * HIDDEN_SIZE,))
    b_hh0 = unif(ks[4], (4 * HIDDEN_SIZE,))
    w_ih1 = unif(ks[5], (4 * HIDDEN_SIZE, HIDDEN_SIZE))
    w_hh1 = unif(ks[6], (4 * HIDDEN_SIZE, HIDDEN_SIZE))
    b_ih1 = unif(ks[7], (4 * HIDDEN_SIZE,))
    b_hh1 = unif(ks[8], (4 * HIDDEN_SIZE,))
    w_proj = 0.1 * jax.random.normal(ks[9], (INPUT_SIZE, HIDDEN_SIZE),
                                     jnp.float32)   # Linear(H -> D), no bias

    # Folded output head: logits = enc @ (W_proj^T @ Emb^T)  -- (H, V)
    w_out = (w_proj.T @ emb.T)

    # precomputed head constants (hoisted out of the kernel body)
    keep = jnp.ones((1, VOCAB_SIZE), jnp.float32)
    keep = (keep.at[0, START_INDEX].set(0.0)
                .at[0, PAD_INDEX].set(0.0)
                .at[0, UNK_INDEX].set(0.0))
    tril = jnp.triu(jnp.ones((VOCAB_SIZE, VOCAB_SIZE), jnp.float32))  # cdf matrix

    bf16 = jnp.bfloat16
    return {"emb": emb.astype(bf16),            # (V, D)
            "wih0": w_ih0.T.astype(bf16),       # (D, 4H)
            "whh0": w_hh0.T.astype(bf16),       # (H, 4H)
            "b0": (b_ih0 + b_hh0)[None, :],     # (1, 4H) f32
            "wih1": w_ih1.T.astype(bf16),       # (H, 4H)
            "whh1": w_hh1.T.astype(bf16),       # (H, 4H)
            "b1": (b_ih1 + b_hh1)[None, :],     # (1, 4H) f32
            "w_out": w_out.astype(bf16),        # (H, V) tied output head
            "keep_mask": keep,                  # (1, V) 0 at START/PAD/UNK
            "tril": tril}                       # (V, V) inverse-CDF matrix


if __name__ == "__main__":
    key = jax.random.PRNGKey(0)
    pkey, tkey, skey = jax.random.split(key, 3)
    params = init_params(pkey)

    B, L = 2, 8
    tokens = jax.random.randint(tkey, (B, L), 4, VOCAB_SIZE, jnp.int32)
    seq_lengths = jnp.array([6, 4])
    tokens = jnp.where(jnp.arange(L)[None, :] < seq_lengths[:, None],
                       tokens, PAD_INDEX)

    out = jax.jit(program_prior_forward)(tokens, params, skey)
    out = jax.tree_util.tree_map(jax.block_until_ready, out)
    assert out["predictions"].shape == (B, L + 1)
    assert out["loss"].shape == (B,)
    print("KERNEL_OK")
</pallas_src>

<mosaic_0001>
module attributes {stable_mosaic.version = 11 : i64} {
  func.func @kernel(%arg0: memref<20x1xi32, #tpu.memory_space<vmem>>, %arg1: memref<20x1xi32, #tpu.memory_space<vmem>>, %arg2: memref<20x1xf32, #tpu.memory_space<vmem>>, %arg3: memref<32x32xbf16, #tpu.memory_space<vmem>>, %arg4: memref<32x128xbf16, #tpu.memory_space<vmem>>, %arg5: memref<32x128xbf16, #tpu.memory_space<vmem>>, %arg6: memref<1x128xf32, #tpu.memory_space<vmem>>, %arg7: memref<32x128xbf16, #tpu.memory_space<vmem>>, %arg8: memref<32x128xbf16, #tpu.memory_space<vmem>>, %arg9: memref<1x128xf32, #tpu.memory_space<vmem>>, %arg10: memref<32x32xbf16, #tpu.memory_space<vmem>>, %arg11: memref<1x32xf32, #tpu.memory_space<vmem>>, %arg12: memref<32x32xf32, #tpu.memory_space<vmem>>, %arg13: memref<20x1xi32, #tpu.memory_space<vmem>>, %arg14: memref<20x1xf32, #tpu.memory_space<vmem>>) attributes {dimension_semantics = [], scalar_prefetch = 0 : i64, scratch_operands = 0 : i64, tpu.core_type = #tpu.core_type<tc>} {
    %0 = tpu.iota {dimensions = array<i32: 1>} : vector<20x32xi32>
    %c0 = arith.constant 0 : index
    %c0_0 = arith.constant 0 : index
    %1 = vector.load %arg0[%c0, %c0_0] : memref<20x1xi32, #tpu.memory_space<vmem>>, vector<20x1xi32>
    %2 = vector.broadcast %1 : vector<20x1xi32> to vector<20x32xi32>
    %3 = arith.cmpi eq, %0, %2 : vector<20x32xi32>
    %4 = arith.extui %3 : vector<20x32xi1> to vector<20x32xi32>
    %5 = arith.sitofp %4 : vector<20x32xi32> to vector<20x32xf32>
    %6 = arith.truncf %5 : vector<20x32xf32> to vector<20x32xbf16>
    %c0_1 = arith.constant 0 : index
    %c0_2 = arith.constant 0 : index
    %7 = vector.load %arg3[%c0_1, %c0_2] : memref<32x32xbf16, #tpu.memory_space<vmem>>, vector<32x32xbf16>
    %cst = arith.constant dense<0.000000e+00> : vector<20x32xf32>
    %8 = tpu.matmul %6, %7, %cst {dimension_numbers = #tpu.dot_dimension_numbers<[1], [0], [0], [1], [0, 0, 1, 1], [], []>} : vector<20x32xbf16>, vector<32x32xbf16>, vector<20x32xf32> -> vector<20x32xf32>
    %9 = arith.truncf %8 : vector<20x32xf32> to vector<20x32xbf16>
    %c0_3 = arith.constant 0 : index
    %c0_4 = arith.constant 0 : index
    %10 = vector.load %arg4[%c0_3, %c0_4] : memref<32x128xbf16, #tpu.memory_space<vmem>>, vector<32x128xbf16>
    %cst_5 = arith.constant dense<0.000000e+00> : vector<20x128xf32>
    %11 = tpu.matmul %9, %10, %cst_5 {dimension_numbers = #tpu.dot_dimension_numbers<[1], [0], [0], [1], [0, 0, 1, 1], [], []>} : vector<20x32xbf16>, vector<32x128xbf16>, vector<20x128xf32> -> vector<20x128xf32>
    %c0_6 = arith.constant 0 : index
    %c0_7 = arith.constant 0 : index
    %12 = vector.load %arg6[%c0_6, %c0_7] : memref<1x128xf32, #tpu.memory_space<vmem>>, vector<1x128xf32>
    %13 = vector.broadcast %12 : vector<1x128xf32> to vector<20x128xf32>
    %14 = arith.addf %11, %13 : vector<20x128xf32>
    %c0_8 = arith.constant 0 : index
    %c0_9 = arith.constant 0 : index
    %15 = vector.load %arg5[%c0_8, %c0_9] : memref<32x128xbf16, #tpu.memory_space<vmem>>, vector<32x128xbf16>
    %c0_10 = arith.constant 0 : index
    %c0_11 = arith.constant 0 : index
    %16 = vector.load %arg8[%c0_10, %c0_11] : memref<32x128xbf16, #tpu.memory_space<vmem>>, vector<32x128xbf16>
    %cst_12 = arith.constant 0.000000e+00 : f32
    %17 = vector.broadcast %cst_12 : f32 to vector<2x32xf32>
    %cst_13 = arith.constant 0.000000e+00 : f32
    %18 = vector.broadcast %cst_13 : f32 to vector<2x32xf32>
    %19 = vector.extract_strided_slice %14 {offsets = [0, 0], sizes = [2, 128], strides = [1, 1]} : vector<20x128xf32> to vector<2x128xf32>
    %20 = arith.truncf %17 : vector<2x32xf32> to vector<2x32xbf16>
    %cst_14 = arith.constant dense<0.000000e+00> : vector<2x128xf32>
    %21 = tpu.matmul %20, %15, %cst_14 {dimension_numbers = #tpu.dot_dimension_numbers<[1], [0], [0], [1], [0, 0, 1, 1], [], []>} : vector<2x32xbf16>, vector<32x128xbf16>, vector<2x128xf32> -> vector<2x128xf32>
    %22 = arith.addf %19, %21 : vector<2x128xf32>
    %23 = arith.negf %22 : vector<2x128xf32>
    %24 = math.exp %23 : vector<2x128xf32>
    %cst_15 = arith.constant 1.000000e+00 : f32
    %25 = vector.broadcast %cst_15 : f32 to vector<2x128xf32>
    %26 = arith.addf %25, %24 : vector<2x128xf32>
    %27 = arith.divf %25, %26 : vector<2x128xf32>
    %28 = math.tanh %22 : vector<2x128xf32>
    %29 = vector.extract_strided_slice %27 {offsets = [0, 0], sizes = [2, 32], strides = [1, 1]} : vector<2x128xf32> to vector<2x32xf32>
    %30 = vector.extract_strided_slice %27 {offsets = [0, 32], sizes = [2, 32], strides = [1, 1]} : vector<2x128xf32> to vector<2x32xf32>
    %31 = vector.extract_strided_slice %28 {offsets = [0, 64], sizes = [2, 32], strides = [1, 1]} : vector<2x128xf32> to vector<2x32xf32>
    %32 = vector.extract_strided_slice %27 {offsets = [0, 96], sizes = [2, 32], strides = [1, 1]} : vector<2x128xf32> to vector<2x32xf32>
    %33 = arith.mulf %30, %18 : vector<2x32xf32>
    %34 = arith.mulf %29, %31 : vector<2x32xf32>
    %35 = arith.addf %33, %34 : vector<2x32xf32>
    %36 = math.tanh %35 : vector<2x32xf32>
    %37 = arith.mulf %32, %36 : vector<2x32xf32>
    %38 = vector.extract_strided_slice %14 {offsets = [2, 0], sizes = [2, 128], strides = [1, 1]} : vector<20x128xf32> to vector<2x128xf32>
    %39 = arith.truncf %37 : vector<2x32xf32> to vector<2x32xbf16>
    %cst_16 = arith.constant dense<0.000000e+00> : vector<2x128xf32>
    %40 = tpu.matmul %39, %15, %cst_16 {dimension_numbers = #tpu.dot_dimension_numbers<[1], [0], [0], [1], [0, 0, 1, 1], [], []>} : vector<2x32xbf16>, vector<32x128xbf16>, vector<2x128xf32> -> vector<2x128xf32>
    %41 = arith.addf %38, %40 : vector<2x128xf32>
    %42 = arith.negf %41 : vector<2x128xf32>
    %43 = math.exp %42 : vector<2x128xf32>
    %cst_17 = arith.constant 1.000000e+00 : f32
    %44 = vector.broadcast %cst_17 : f32 to vector<2x128xf32>
    %45 = arith.addf %44, %43 : vector<2x128xf32>
    %46 = arith.divf %44, %45 : vector<2x128xf32>
    %47 = math.tanh %41 : vector<2x128xf32>
    %48 = vector.extract_strided_slice %46 {offsets = [0, 0], sizes = [2, 32], strides = [1, 1]} : vector<2x128xf32> to vector<2x32xf32>
    %49 = vector.extract_strided_slice %46 {offsets = [0, 32], sizes = [2, 32], strides = [1, 1]} : vector<2x128xf32> to vector<2x32xf32>
    %50 = vector.extract_strided_slice %47 {offsets = [0, 64], sizes = [2, 32], strides = [1, 1]} : vector<2x128xf32> to vector<2x32xf32>
    %51 = vector.extract_strided_slice %46 {offsets = [0, 96], sizes = [2, 32], strides = [1, 1]} : vector<2x128xf32> to vector<2x32xf32>
    %52 = arith.mulf %49, %35 : vector<2x32xf32>
    %53 = arith.mulf %48, %50 : vector<2x32xf32>
    %54 = arith.addf %52, %53 : vector<2x32xf32>
    %55 = math.tanh %54 : vector<2x32xf32>
    %56 = arith.mulf %51, %55 : vector<2x32xf32>
    %57 = vector.extract_strided_slice %14 {offsets = [4, 0], sizes = [2, 128], strides = [1, 1]} : vector<20x128xf32> to vector<2x128xf32>
    %58 = arith.truncf %56 : vector<2x32xf32> to vector<2x32xbf16>
    %cst_18 = arith.constant dense<0.000000e+00> : vector<2x128xf32>
    %59 = tpu.matmul %58, %15, %cst_18 {dimension_numbers = #tpu.dot_dimension_numbers<[1], [0], [0], [1], [0, 0, 1, 1], [], []>} : vector<2x32xbf16>, vector<32x128xbf16>, vector<2x128xf32> -> vector<2x128xf32>
    %60 = arith.addf %57, %59 : vector<2x128xf32>
    %61 = arith.negf %60 : vector<2x128xf32>
    %62 = math.exp %61 : vector<2x128xf32>
    %cst_19 = arith.constant 1.000000e+00 : f32
    %63 = vector.broadcast %cst_19 : f32 to vector<2x128xf32>
    %64 = arith.addf %63, %62 : vector<2x128xf32>
    %65 = arith.divf %63, %64 : vector<2x128xf32>
    %66 = math.tanh %60 : vector<2x128xf32>
    %67 = vector.extract_strided_slice %65 {offsets = [0, 0], sizes = [2, 32], strides = [1, 1]} : vector<2x128xf32> to vector<2x32xf32>
    %68 = vector.extract_strided_slice %65 {offsets = [0, 32], sizes = [2, 32], strides = [1, 1]} : vector<2x128xf32> to vector<2x32xf32>
    %69 = vector.extract_strided_slice %66 {offsets = [0, 64], sizes = [2, 32], strides = [1, 1]} : vector<2x128xf32> to vector<2x32xf32>
    %70 = vector.extract_strided_slice %65 {offsets = [0, 96], sizes = [2, 32], strides = [1, 1]} : vector<2x128xf32> to vector<2x32xf32>
    %71 = arith.mulf %68, %54 : vector<2x32xf32>
    %72 = arith.mulf %67, %69 : vector<2x32xf32>
    %73 = arith.addf %71, %72 : vector<2x32xf32>
    %74 = math.tanh %73 : vector<2x32xf32>
    %75 = arith.mulf %70, %74 : vector<2x32xf32>
    %76 = vector.extract_strided_slice %14 {offsets = [6, 0], sizes = [2, 128], strides = [1, 1]} : vector<20x128xf32> to vector<2x128xf32>
    %77 = arith.truncf %75 : vector<2x32xf32> to vector<2x32xbf16>
    %cst_20 = arith.constant dense<0.000000e+00> : vector<2x128xf32>
    %78 = tpu.matmul %77, %15, %cst_20 {dimension_numbers = #tpu.dot_dimension_numbers<[1], [0], [0], [1], [0, 0, 1, 1], [], []>} : vector<2x32xbf16>, vector<32x128xbf16>, vector<2x128xf32> -> vector<2x128xf32>
    %79 = arith.addf %76, %78 : vector<2x128xf32>
    %80 = arith.negf %79 : vector<2x128xf32>
    %81 = math.exp %80 : vector<2x128xf32>
    %cst_21 = arith.constant 1.000000e+00 : f32
    %82 = vector.broadcast %cst_21 : f32 to vector<2x128xf32>
    %83 = arith.addf %82, %81 : vector<2x128xf32>
    %84 = arith.divf %82, %83 : vector<2x128xf32>
    %85 = math.tanh %79 : vector<2x128xf32>
    %86 = vector.extract_strided_slice %84 {offsets = [0, 0], sizes = [2, 32], strides = [1, 1]} : vector<2x128xf32> to vector<2x32xf32>
    %87 = vector.extract_strided_slice %84 {offsets = [0, 32], sizes = [2, 32], strides = [1, 1]} : vector<2x128xf32> to vector<2x32xf32>
    %88 = vector.extract_strided_slice %85 {offsets = [0, 64], sizes = [2, 32], strides = [1, 1]} : vector<2x128xf32> to vector<2x32xf32>
    %89 = vector.extract_strided_slice %84 {offsets = [0, 96], sizes = [2, 32], strides = [1, 1]} : vector<2x128xf32> to vector<2x32xf32>
    %90 = arith.mulf %87, %73 : vector<2x32xf32>
    %91 = arith.mulf %86, %88 : vector<2x32xf32>
    %92 = arith.addf %90, %91 : vector<2x32xf32>
    %93 = math.tanh %92 : vector<2x32xf32>
    %94 = arith.mulf %89, %93 : vector<2x32xf32>
    %95 = vector.extract_strided_slice %14 {offsets = [8, 0], sizes = [2, 128], strides = [1, 1]} : vector<20x128xf32> to vector<2x128xf32>
    %96 = arith.truncf %94 : vector<2x32xf32> to vector<2x32xbf16>
    %cst_22 = arith.constant dense<0.000000e+00> : vector<2x128xf32>
    %97 = tpu.matmul %96, %15, %cst_22 {dimension_numbers = #tpu.dot_dimension_numbers<[1], [0], [0], [1], [0, 0, 1, 1], [], []>} : vector<2x32xbf16>, vector<32x128xbf16>, vector<2x128xf32> -> vector<2x128xf32>
    %98 = arith.addf %95, %97 : vector<2x128xf32>
    %99 = arith.negf %98 : vector<2x128xf32>
    %100 = math.exp %99 : vector<2x128xf32>
    %cst_23 = arith.constant 1.000000e+00 : f32
    %101 = vector.broadcast %cst_23 : f32 to vector<2x128xf32>
    %102 = arith.addf %101, %100 : vector<2x128xf32>
    %103 = arith.divf %101, %102 : vector<2x128xf32>
    %104 = math.tanh %98 : vector<2x128xf32>
    %105 = vector.extract_strided_slice %103 {offsets = [0, 0], sizes = [2, 32], strides = [1, 1]} : vector<2x128xf32> to vector<2x32xf32>
    %106 = vector.extract_strided_slice %103 {offsets = [0, 32], sizes = [2, 32], strides = [1, 1]} : vector<2x128xf32> to vector<2x32xf32>
    %107 = vector.extract_strided_slice %104 {offsets = [0, 64], sizes = [2, 32], strides = [1, 1]} : vector<2x128xf32> to vector<2x32xf32>
    %108 = vector.extract_strided_slice %103 {offsets = [0, 96], sizes = [2, 32], strides = [1, 1]} : vector<2x128xf32> to vector<2x32xf32>
    %109 = arith.mulf %106, %92 : vector<2x32xf32>
    %110 = arith.mulf %105, %107 : vector<2x32xf32>
    %111 = arith.addf %109, %110 : vector<2x32xf32>
    %112 = math.tanh %111 : vector<2x32xf32>
    %113 = arith.mulf %108, %112 : vector<2x32xf32>
    %114 = vector.extract_strided_slice %14 {offsets = [10, 0], sizes = [2, 128], strides = [1, 1]} : vector<20x128xf32> to vector<2x128xf32>
    %115 = arith.truncf %113 : vector<2x32xf32> to vector<2x32xbf16>
    %cst_24 = arith.constant dense<0.000000e+00> : vector<2x128xf32>
    %116 = tpu.matmul %115, %15, %cst_24 {dimension_numbers = #tpu.dot_dimension_numbers<[1], [0], [0], [1], [0, 0, 1, 1], [], []>} : vector<2x32xbf16>, vector<32x128xbf16>, vector<2x128xf32> -> vector<2x128xf32>
    %117 = arith.addf %114, %116 : vector<2x128xf32>
    %118 = arith.negf %117 : vector<2x128xf32>
    %119 = math.exp %118 : vector<2x128xf32>
    %cst_25 = arith.constant 1.000000e+00 : f32
    %120 = vector.broadcast %cst_25 : f32 to vector<2x128xf32>
    %121 = arith.addf %120, %119 : vector<2x128xf32>
    %122 = arith.divf %120, %121 : vector<2x128xf32>
    %123 = math.tanh %117 : vector<2x128xf32>
    %124 = vector.extract_strided_slice %122 {offsets = [0, 0], sizes = [2, 32], strides = [1, 1]} : vector<2x128xf32> to vector<2x32xf32>
    %125 = vector.extract_strided_slice %122 {offsets = [0, 32], sizes = [2, 32], strides = [1, 1]} : vector<2x128xf32> to vector<2x32xf32>
    %126 = vector.extract_strided_slice %123 {offsets = [0, 64], sizes = [2, 32], strides = [1, 1]} : vector<2x128xf32> to vector<2x32xf32>
    %127 = vector.extract_strided_slice %122 {offsets = [0, 96], sizes = [2, 32], strides = [1, 1]} : vector<2x128xf32> to vector<2x32xf32>
    %128 = arith.mulf %125, %111 : vector<2x32xf32>
    %129 = arith.mulf %124, %126 : vector<2x32xf32>
    %130 = arith.addf %128, %129 : vector<2x32xf32>
    %131 = math.tanh %130 : vector<2x32xf32>
    %132 = arith.mulf %127, %131 : vector<2x32xf32>
    %133 = vector.extract_strided_slice %14 {offsets = [12, 0], sizes = [2, 128], strides = [1, 1]} : vector<20x128xf32> to vector<2x128xf32>
    %134 = arith.truncf %132 : vector<2x32xf32> to vector<2x32xbf16>
    %cst_26 = arith.constant dense<0.000000e+00> : vector<2x128xf32>
    %135 = tpu.matmul %134, %15, %cst_26 {dimension_numbers = #tpu.dot_dimension_numbers<[1], [0], [0], [1], [0, 0, 1, 1], [], []>} : vector<2x32xbf16>, vector<32x128xbf16>, vector<2x128xf32> -> vector<2x128xf32>
    %136 = arith.addf %133, %135 : vector<2x128xf32>
    %137 = arith.negf %136 : vector<2x128xf32>
    %138 = math.exp %137 : vector<2x128xf32>
    %cst_27 = arith.constant 1.000000e+00 : f32
    %139 = vector.broadcast %cst_27 : f32 to vector<2x128xf32>
    %140 = arith.addf %139, %138 : vector<2x128xf32>
    %141 = arith.divf %139, %140 : vector<2x128xf32>
    %142 = math.tanh %136 : vector<2x128xf32>
    %143 = vector.extract_strided_slice %141 {offsets = [0, 0], sizes = [2, 32], strides = [1, 1]} : vector<2x128xf32> to vector<2x32xf32>
    %144 = vector.extract_strided_slice %141 {offsets = [0, 32], sizes = [2, 32], strides = [1, 1]} : vector<2x128xf32> to vector<2x32xf32>
    %145 = vector.extract_strided_slice %142 {offsets = [0, 64], sizes = [2, 32], strides = [1, 1]} : vector<2x128xf32> to vector<2x32xf32>
    %146 = vector.extract_strided_slice %141 {offsets = [0, 96], sizes = [2, 32], strides = [1, 1]} : vector<2x128xf32> to vector<2x32xf32>
    %147 = arith.mulf %144, %130 : vector<2x32xf32>
    %148 = arith.mulf %143, %145 : vector<2x32xf32>
    %149 = arith.addf %147, %148 : vector<2x32xf32>
    %150 = math.tanh %149 : vector<2x32xf32>
    %151 = arith.mulf %146, %150 : vector<2x32xf32>
    %152 = vector.extract_strided_slice %14 {offsets = [14, 0], sizes = [2, 128], strides = [1, 1]} : vector<20x128xf32> to vector<2x128xf32>
    %153 = arith.truncf %151 : vector<2x32xf32> to vector<2x32xbf16>
    %cst_28 = arith.constant dense<0.000000e+00> : vector<2x128xf32>
    %154 = tpu.matmul %153, %15, %cst_28 {dimension_numbers = #tpu.dot_dimension_numbers<[1], [0], [0], [1], [0, 0, 1, 1], [], []>} : vector<2x32xbf16>, vector<32x128xbf16>, vector<2x128xf32> -> vector<2x128xf32>
    %155 = arith.addf %152, %154 : vector<2x128xf32>
    %156 = arith.negf %155 : vector<2x128xf32>
    %157 = math.exp %156 : vector<2x128xf32>
    %cst_29 = arith.constant 1.000000e+00 : f32
    %158 = vector.broadcast %cst_29 : f32 to vector<2x128xf32>
    %159 = arith.addf %158, %157 : vector<2x128xf32>
    %160 = arith.divf %158, %159 : vector<2x128xf32>
    %161 = math.tanh %155 : vector<2x128xf32>
    %162 = vector.extract_strided_slice %160 {offsets = [0, 0], sizes = [2, 32], strides = [1, 1]} : vector<2x128xf32> to vector<2x32xf32>
    %163 = vector.extract_strided_slice %160 {offsets = [0, 32], sizes = [2, 32], strides = [1, 1]} : vector<2x128xf32> to vector<2x32xf32>
    %164 = vector.extract_strided_slice %161 {offsets = [0, 64], sizes = [2, 32], strides = [1, 1]} : vector<2x128xf32> to vector<2x32xf32>
    %165 = vector.extract_strided_slice %160 {offsets = [0, 96], sizes = [2, 32], strides = [1, 1]} : vector<2x128xf32> to vector<2x32xf32>
    %166 = arith.mulf %163, %149 : vector<2x32xf32>
    %167 = arith.mulf %162, %164 : vector<2x32xf32>
    %168 = arith.addf %166, %167 : vector<2x32xf32>
    %169 = math.tanh %168 : vector<2x32xf32>
    %170 = arith.mulf %165, %169 : vector<2x32xf32>
    %171 = vector.extract_strided_slice %14 {offsets = [16, 0], sizes = [2, 128], strides = [1, 1]} : vector<20x128xf32> to vector<2x128xf32>
    %172 = arith.truncf %170 : vector<2x32xf32> to vector<2x32xbf16>
    %cst_30 = arith.constant dense<0.000000e+00> : vector<2x128xf32>
    %173 = tpu.matmul %172, %15, %cst_30 {dimension_numbers = #tpu.dot_dimension_numbers<[1], [0], [0], [1], [0, 0, 1, 1], [], []>} : vector<2x32xbf16>, vector<32x128xbf16>, vector<2x128xf32> -> vector<2x128xf32>
    %174 = arith.addf %171, %173 : vector<2x128xf32>
    %175 = arith.negf %174 : vector<2x128xf32>
    %176 = math.exp %175 : vector<2x128xf32>
    %cst_31 = arith.constant 1.000000e+00 : f32
    %177 = vector.broadcast %cst_31 : f32 to vector<2x128xf32>
    %178 = arith.addf %177, %176 : vector<2x128xf32>
    %179 = arith.divf %177, %178 : vector<2x128xf32>
    %180 = math.tanh %174 : vector<2x128xf32>
    %181 = vector.extract_strided_slice %179 {offsets = [0, 0], sizes = [2, 32], strides = [1, 1]} : vector<2x128xf32> to vector<2x32xf32>
    %182 = vector.extract_strided_slice %179 {offsets = [0, 32], sizes = [2, 32], strides = [1, 1]} : vector<2x128xf32> to vector<2x32xf32>
    %183 = vector.extract_strided_slice %180 {offsets = [0, 64], sizes = [2, 32], strides = [1, 1]} : vector<2x128xf32> to vector<2x32xf32>
    %184 = vector.extract_strided_slice %179 {offsets = [0, 96], sizes = [2, 32], strides = [1, 1]} : vector<2x128xf32> to vector<2x32xf32>
    %185 = arith.mulf %182, %168 : vector<2x32xf32>
    %186 = arith.mulf %181, %183 : vector<2x32xf32>
    %187 = arith.addf %185, %186 : vector<2x32xf32>
    %188 = math.tanh %187 : vector<2x32xf32>
    %189 = arith.mulf %184, %188 : vector<2x32xf32>
    %190 = vector.extract_strided_slice %14 {offsets = [18, 0], sizes = [2, 128], strides = [1, 1]} : vector<20x128xf32> to vector<2x128xf32>
    %191 = arith.truncf %189 : vector<2x32xf32> to vector<2x32xbf16>
    %cst_32 = arith.constant dense<0.000000e+00> : vector<2x128xf32>
    %192 = tpu.matmul %191, %15, %cst_32 {dimension_numbers = #tpu.dot_dimension_numbers<[1], [0], [0], [1], [0, 0, 1, 1], [], []>} : vector<2x32xbf16>, vector<32x128xbf16>, vector<2x128xf32> -> vector<2x128xf32>
    %193 = arith.addf %190, %192 : vector<2x128xf32>
    %194 = arith.negf %193 : vector<2x128xf32>
    %195 = math.exp %194 : vector<2x128xf32>
    %cst_33 = arith.constant 1.000000e+00 : f32
    %196 = vector.broadcast %cst_33 : f32 to vector<2x128xf32>
    %197 = arith.addf %196, %195 : vector<2x128xf32>
    %198 = arith.divf %196, %197 : vector<2x128xf32>
    %199 = math.tanh %193 : vector<2x128xf32>
    %200 = vector.extract_strided_slice %198 {offsets = [0, 0], sizes = [2, 32], strides = [1, 1]} : vector<2x128xf32> to vector<2x32xf32>
    %201 = vector.extract_strided_slice %198 {offsets = [0, 32], sizes = [2, 32], strides = [1, 1]} : vector<2x128xf32> to vector<2x32xf32>
    %202 = vector.extract_strided_slice %199 {offsets = [0, 64], sizes = [2, 32], strides = [1, 1]} : vector<2x128xf32> to vector<2x32xf32>
    %203 = vector.extract_strided_slice %198 {offsets = [0, 96], sizes = [2, 32], strides = [1, 1]} : vector<2x128xf32> to vector<2x32xf32>
    %204 = arith.mulf %201, %187 : vector<2x32xf32>
    %205 = arith.mulf %200, %202 : vector<2x32xf32>
    %206 = arith.addf %204, %205 : vector<2x32xf32>
    %207 = math.tanh %206 : vector<2x32xf32>
    %208 = arith.mulf %203, %207 : vector<2x32xf32>
    %209 = tpu.concatenate %37, %56, %75, %94, %113, %132, %151, %170, %189, %208 in 0 : vector<2x32xf32>, vector<2x32xf32>, vector<2x32xf32>, vector<2x32xf32>, vector<2x32xf32>, vector<2x32xf32>, vector<2x32xf32>, vector<2x32xf32>, vector<2x32xf32>, vector<2x32xf32> -> vector<20x32xf32>
    %210 = arith.truncf %209 : vector<20x32xf32> to vector<20x32xbf16>
    %c0_34 = arith.constant 0 : index
    %c0_35 = arith.constant 0 : index
    %211 = vector.load %arg7[%c0_34, %c0_35] : memref<32x128xbf16, #tpu.memory_space<vmem>>, vector<32x128xbf16>
    %cst_36 = arith.constant dense<0.000000e+00> : vector<20x128xf32>
    %212 = tpu.matmul %210, %211, %cst_36 {dimension_numbers = #tpu.dot_dimension_numbers<[1], [0], [0], [1], [0, 0, 1, 1], [], []>} : vector<20x32xbf16>, vector<32x128xbf16>, vector<20x128xf32> -> vector<20x128xf32>
    %c0_37 = arith.constant 0 : index
    %c0_38 = arith.constant 0 : index
    %213 = vector.load %arg9[%c0_37, %c0_38] : memref<1x128xf32, #tpu.memory_space<vmem>>, vector<1x128xf32>
    %214 = vector.broadcast %213 : vector<1x128xf32> to vector<20x128xf32>
    %215 = arith.addf %212, %214 : vector<20x128xf32>
    %cst_39 = arith.constant 0.000000e+00 : f32
    %216 = vector.broadcast %cst_39 : f32 to vector<2x32xf32>
    %cst_40 = arith.constant 0.000000e+00 : f32
    %217 = vector.broadcast %cst_40 : f32 to vector<2x32xf32>
    %218 = vector.extract_strided_slice %215 {offsets = [0, 0], sizes = [2, 128], strides = [1, 1]} : vector<20x128xf32> to vector<2x128xf32>
    %219 = arith.truncf %216 : vector<2x32xf32> to vector<2x32xbf16>
    %cst_41 = arith.constant dense<0.000000e+00> : vector<2x128xf32>
    %220 = tpu.matmul %219, %16, %cst_41 {dimension_numbers = #tpu.dot_dimension_numbers<[1], [0], [0], [1], [0, 0, 1, 1], [], []>} : vector<2x32xbf16>, vector<32x128xbf16>, vector<2x128xf32> -> vector<2x128xf32>
    %221 = arith.addf %218, %220 : vector<2x128xf32>
    %222 = arith.negf %221 : vector<2x128xf32>
    %223 = math.exp %222 : vector<2x128xf32>
    %cst_42 = arith.constant 1.000000e+00 : f32
    %224 = vector.broadcast %cst_42 : f32 to vector<2x128xf32>
    %225 = arith.addf %224, %223 : vector<2x128xf32>
    %226 = arith.divf %224, %225 : vector<2x128xf32>
    %227 = math.tanh %221 : vector<2x128xf32>
    %228 = vector.extract_strided_slice %226 {offsets = [0, 0], sizes = [2, 32], strides = [1, 1]} : vector<2x128xf32> to vector<2x32xf32>
    %229 = vector.extract_strided_slice %226 {offsets = [0, 32], sizes = [2, 32], strides = [1, 1]} : vector<2x128xf32> to vector<2x32xf32>
    %230 = vector.extract_strided_slice %227 {offsets = [0, 64], sizes = [2, 32], strides = [1, 1]} : vector<2x128xf32> to vector<2x32xf32>
    %231 = vector.extract_strided_slice %226 {offsets = [0, 96], sizes = [2, 32], strides = [1, 1]} : vector<2x128xf32> to vector<2x32xf32>
    %232 = arith.mulf %229, %217 : vector<2x32xf32>
    %233 = arith.mulf %228, %230 : vector<2x32xf32>
    %234 = arith.addf %232, %233 : vector<2x32xf32>
    %235 = math.tanh %234 : vector<2x32xf32>
    %236 = arith.mulf %231, %235 : vector<2x32xf32>
    %237 = vector.extract_strided_slice %215 {offsets = [2, 0], sizes = [2, 128], strides = [1, 1]} : vector<20x128xf32> to vector<2x128xf32>
    %238 = arith.truncf %236 : vector<2x32xf32> to vector<2x32xbf16>
    %cst_43 = arith.constant dense<0.000000e+00> : vector<2x128xf32>
    %239 = tpu.matmul %238, %16, %cst_43 {dimension_numbers = #tpu.dot_dimension_numbers<[1], [0], [0], [1], [0, 0, 1, 1], [], []>} : vector<2x32xbf16>, vector<32x128xbf16>, vector<2x128xf32> -> vector<2x128xf32>
    %240 = arith.addf %237, %239 : vector<2x128xf32>
    %241 = arith.negf %240 : vector<2x128xf32>
    %242 = math.exp %241 : vector<2x128xf32>
    %cst_44 = arith.constant 1.000000e+00 : f32
    %243 = vector.broadcast %cst_44 : f32 to vector<2x128xf32>
    %244 = arith.addf %243, %242 : vector<2x128xf32>
    %245 = arith.divf %243, %244 : vector<2x128xf32>
    %246 = math.tanh %240 : vector<2x128xf32>
    %247 = vector.extract_strided_slice %245 {offsets = [0, 0], sizes = [2, 32], strides = [1, 1]} : vector<2x128xf32> to vector<2x32xf32>
    %248 = vector.extract_strided_slice %245 {offsets = [0, 32], sizes = [2, 32], strides = [1, 1]} : vector<2x128xf32> to vector<2x32xf32>
    %249 = vector.extract_strided_slice %246 {offsets = [0, 64], sizes = [2, 32], strides = [1, 1]} : vector<2x128xf32> to vector<2x32xf32>
    %250 = vector.extract_strided_slice %245 {offsets = [0, 96], sizes = [2, 32], strides = [1, 1]} : vector<2x128xf32> to vector<2x32xf32>
    %251 = arith.mulf %248, %234 : vector<2x32xf32>
    %252 = arith.mulf %247, %249 : vector<2x32xf32>
    %253 = arith.addf %251, %252 : vector<2x32xf32>
    %254 = math.tanh %253 : vector<2x32xf32>
    %255 = arith.mulf %250, %254 : vector<2x32xf32>
    %256 = vector.extract_strided_slice %215 {offsets = [4, 0], sizes = [2, 128], strides = [1, 1]} : vector<20x128xf32> to vector<2x128xf32>
    %257 = arith.truncf %255 : vector<2x32xf32> to vector<2x32xbf16>
    %cst_45 = arith.constant dense<0.000000e+00> : vector<2x128xf32>
    %258 = tpu.matmul %257, %16, %cst_45 {dimension_numbers = #tpu.dot_dimension_numbers<[1], [0], [0], [1], [0, 0, 1, 1], [], []>} : vector<2x32xbf16>, vector<32x128xbf16>, vector<2x128xf32> -> vector<2x128xf32>
    %259 = arith.addf %256, %258 : vector<2x128xf32>
    %260 = arith.negf %259 : vector<2x128xf32>
    %261 = math.exp %260 : vector<2x128xf32>
    %cst_46 = arith.constant 1.000000e+00 : f32
    %262 = vector.broadcast %cst_46 : f32 to vector<2x128xf32>
    %263 = arith.addf %262, %261 : vector<2x128xf32>
    %264 = arith.divf %262, %263 : vector<2x128xf32>
    %265 = math.tanh %259 : vector<2x128xf32>
    %266 = vector.extract_strided_slice %264 {offsets = [0, 0], sizes = [2, 32], strides = [1, 1]} : vector<2x128xf32> to vector<2x32xf32>
    %267 = vector.extract_strided_slice %264 {offsets = [0, 32], sizes = [2, 32], strides = [1, 1]} : vector<2x128xf32> to vector<2x32xf32>
    %268 = vector.extract_strided_slice %265 {offsets = [0, 64], sizes = [2, 32], strides = [1, 1]} : vector<2x128xf32> to vector<2x32xf32>
    %269 = vector.extract_strided_slice %264 {offsets = [0, 96], sizes = [2, 32], strides = [1, 1]} : vector<2x128xf32> to vector<2x32xf32>
    %270 = arith.mulf %267, %253 : vector<2x32xf32>
    %271 = arith.mulf %266, %268 : vector<2x32xf32>
    %272 = arith.addf %270, %271 : vector<2x32xf32>
    %273 = math.tanh %272 : vector<2x32xf32>
    %274 = arith.mulf %269, %273 : vector<2x32xf32>
    %275 = vector.extract_strided_slice %215 {offsets = [6, 0], sizes = [2, 128], strides = [1, 1]} : vector<20x128xf32> to vector<2x128xf32>
    %276 = arith.truncf %274 : vector<2x32xf32> to vector<2x32xbf16>
    %cst_47 = arith.constant dense<0.000000e+00> : vector<2x128xf32>
    %277 = tpu.matmul %276, %16, %cst_47 {dimension_numbers = #tpu.dot_dimension_numbers<[1], [0], [0], [1], [0, 0, 1, 1], [], []>} : vector<2x32xbf16>, vector<32x128xbf16>, vector<2x128xf32> -> vector<2x128xf32>
    %278 = arith.addf %275, %277 : vector<2x128xf32>
    %279 = arith.negf %278 : vector<2x128xf32>
    %280 = math.exp %279 : vector<2x128xf32>
    %cst_48 = arith.constant 1.000000e+00 : f32
    %281 = vector.broadcast %cst_48 : f32 to vector<2x128xf32>
    %282 = arith.addf %281, %280 : vector<2x128xf32>
    %283 = arith.divf %281, %282 : vector<2x128xf32>
    %284 = math.tanh %278 : vector<2x128xf32>
    %285 = vector.extract_strided_slice %283 {offsets = [0, 0], sizes = [2, 32], strides = [1, 1]} : vector<2x128xf32> to vector<2x32xf32>
    %286 = vector.extract_strided_slice %283 {offsets = [0, 32], sizes = [2, 32], strides = [1, 1]} : vector<2x128xf32> to vector<2x32xf32>
    %287 = vector.extract_strided_slice %284 {offsets = [0, 64], sizes = [2, 32], strides = [1, 1]} : vector<2x128xf32> to vector<2x32xf32>
    %288 = vector.extract_strided_slice %283 {offsets = [0, 96], sizes = [2, 32], strides = [1, 1]} : vector<2x128xf32> to vector<2x32xf32>
    %289 = arith.mulf %286, %272 : vector<2x32xf32>
    %290 = arith.mulf %285, %287 : vector<2x32xf32>
    %291 = arith.addf %289, %290 : vector<2x32xf32>
    %292 = math.tanh %291 : vector<2x32xf32>
    %293 = arith.mulf %288, %292 : vector<2x32xf32>
    %294 = vector.extract_strided_slice %215 {offsets = [8, 0], sizes = [2, 128], strides = [1, 1]} : vector<20x128xf32> to vector<2x128xf32>
    %295 = arith.truncf %293 : vector<2x32xf32> to vector<2x32xbf16>
    %cst_49 = arith.constant dense<0.000000e+00> : vector<2x128xf32>
    %296 = tpu.matmul %295, %16, %cst_49 {dimension_numbers = #tpu.dot_dimension_numbers<[1], [0], [0], [1], [0, 0, 1, 1], [], []>} : vector<2x32xbf16>, vector<32x128xbf16>, vector<2x128xf32> -> vector<2x128xf32>
    %297 = arith.addf %294, %296 : vector<2x128xf32>
    %298 = arith.negf %297 : vector<2x128xf32>
    %299 = math.exp %298 : vector<2x128xf32>
    %cst_50 = arith.constant 1.000000e+00 : f32
    %300 = vector.broadcast %cst_50 : f32 to vector<2x128xf32>
    %301 = arith.addf %300, %299 : vector<2x128xf32>
    %302 = arith.divf %300, %301 : vector<2x128xf32>
    %303 = math.tanh %297 : vector<2x128xf32>
    %304 = vector.extract_strided_slice %302 {offsets = [0, 0], sizes = [2, 32], strides = [1, 1]} : vector<2x128xf32> to vector<2x32xf32>
    %305 = vector.extract_strided_slice %302 {offsets = [0, 32], sizes = [2, 32], strides = [1, 1]} : vector<2x128xf32> to vector<2x32xf32>
    %306 = vector.extract_strided_slice %303 {offsets = [0, 64], sizes = [2, 32], strides = [1, 1]} : vector<2x128xf32> to vector<2x32xf32>
    %307 = vector.extract_strided_slice %302 {offsets = [0, 96], sizes = [2, 32], strides = [1, 1]} : vector<2x128xf32> to vector<2x32xf32>
    %308 = arith.mulf %305, %291 : vector<2x32xf32>
    %309 = arith.mulf %304, %306 : vector<2x32xf32>
    %310 = arith.addf %308, %309 : vector<2x32xf32>
    %311 = math.tanh %310 : vector<2x32xf32>
    %312 = arith.mulf %307, %311 : vector<2x32xf32>
    %313 = vector.extract_strided_slice %215 {offsets = [10, 0], sizes = [2, 128], strides = [1, 1]} : vector<20x128xf32> to vector<2x128xf32>
    %314 = arith.truncf %312 : vector<2x32xf32> to vector<2x32xbf16>
    %cst_51 = arith.constant dense<0.000000e+00> : vector<2x128xf32>
    %315 = tpu.matmul %314, %16, %cst_51 {dimension_numbers = #tpu.dot_dimension_numbers<[1], [0], [0], [1], [0, 0, 1, 1], [], []>} : vector<2x32xbf16>, vector<32x128xbf16>, vector<2x128xf32> -> vector<2x128xf32>
    %316 = arith.addf %313, %315 : vector<2x128xf32>
    %317 = arith.negf %316 : vector<2x128xf32>
    %318 = math.exp %317 : vector<2x128xf32>
    %cst_52 = arith.constant 1.000000e+00 : f32
    %319 = vector.broadcast %cst_52 : f32 to vector<2x128xf32>
    %320 = arith.addf %319, %318 : vector<2x128xf32>
    %321 = arith.divf %319, %320 : vector<2x128xf32>
    %322 = math.tanh %316 : vector<2x128xf32>
    %323 = vector.extract_strided_slice %321 {offsets = [0, 0], sizes = [2, 32], strides = [1, 1]} : vector<2x128xf32> to vector<2x32xf32>
    %324 = vector.extract_strided_slice %321 {offsets = [0, 32], sizes = [2, 32], strides = [1, 1]} : vector<2x128xf32> to vector<2x32xf32>
    %325 = vector.extract_strided_slice %322 {offsets = [0, 64], sizes = [2, 32], strides = [1, 1]} : vector<2x128xf32> to vector<2x32xf32>
    %326 = vector.extract_strided_slice %321 {offsets = [0, 96], sizes = [2, 32], strides = [1, 1]} : vector<2x128xf32> to vector<2x32xf32>
    %327 = arith.mulf %324, %310 : vector<2x32xf32>
    %328 = arith.mulf %323, %325 : vector<2x32xf32>
    %329 = arith.addf %327, %328 : vector<2x32xf32>
    %330 = math.tanh %329 : vector<2x32xf32>
    %331 = arith.mulf %326, %330 : vector<2x32xf32>
    %332 = vector.extract_strided_slice %215 {offsets = [12, 0], sizes = [2, 128], strides = [1, 1]} : vector<20x128xf32> to vector<2x128xf32>
    %333 = arith.truncf %331 : vector<2x32xf32> to vector<2x32xbf16>
    %cst_53 = arith.constant dense<0.000000e+00> : vector<2x128xf32>
    %334 = tpu.matmul %333, %16, %cst_53 {dimension_numbers = #tpu.dot_dimension_numbers<[1], [0], [0], [1], [0, 0, 1, 1], [], []>} : vector<2x32xbf16>, vector<32x128xbf16>, vector<2x128xf32> -> vector<2x128xf32>
    %335 = arith.addf %332, %334 : vector<2x128xf32>
    %336 = arith.negf %335 : vector<2x128xf32>
    %337 = math.exp %336 : vector<2x128xf32>
    %cst_54 = arith.constant 1.000000e+00 : f32
    %338 = vector.broadcast %cst_54 : f32 to vector<2x128xf32>
    %339 = arith.addf %338, %337 : vector<2x128xf32>
    %340 = arith.divf %338, %339 : vector<2x128xf32>
    %341 = math.tanh %335 : vector<2x128xf32>
    %342 = vector.extract_strided_slice %340 {offsets = [0, 0], sizes = [2, 32], strides = [1, 1]} : vector<2x128xf32> to vector<2x32xf32>
    %343 = vector.extract_strided_slice %340 {offsets = [0, 32], sizes = [2, 32], strides = [1, 1]} : vector<2x128xf32> to vector<2x32xf32>
    %344 = vector.extract_strided_slice %341 {offsets = [0, 64], sizes = [2, 32], strides = [1, 1]} : vector<2x128xf32> to vector<2x32xf32>
    %345 = vector.extract_strided_slice %340 {offsets = [0, 96], sizes = [2, 32], strides = [1, 1]} : vector<2x128xf32> to vector<2x32xf32>
    %346 = arith.mulf %343, %329 : vector<2x32xf32>
    %347 = arith.mulf %342, %344 : vector<2x32xf32>
    %348 = arith.addf %346, %347 : vector<2x32xf32>
    %349 = math.tanh %348 : vector<2x32xf32>
    %350 = arith.mulf %345, %349 : vector<2x32xf32>
    %351 = vector.extract_strided_slice %215 {offsets = [14, 0], sizes = [2, 128], strides = [1, 1]} : vector<20x128xf32> to vector<2x128xf32>
    %352 = arith.truncf %350 : vector<2x32xf32> to vector<2x32xbf16>
    %cst_55 = arith.constant dense<0.000000e+00> : vector<2x128xf32>
    %353 = tpu.matmul %352, %16, %cst_55 {dimension_numbers = #tpu.dot_dimension_numbers<[1], [0], [0], [1], [0, 0, 1, 1], [], []>} : vector<2x32xbf16>, vector<32x128xbf16>, vector<2x128xf32> -> vector<2x128xf32>
    %354 = arith.addf %351, %353 : vector<2x128xf32>
    %355 = arith.negf %354 : vector<2x128xf32>
    %356 = math.exp %355 : vector<2x128xf32>
    %cst_56 = arith.constant 1.000000e+00 : f32
    %357 = vector.broadcast %cst_56 : f32 to vector<2x128xf32>
    %358 = arith.addf %357, %356 : vector<2x128xf32>
    %359 = arith.divf %357, %358 : vector<2x128xf32>
    %360 = math.tanh %354 : vector<2x128xf32>
    %361 = vector.extract_strided_slice %359 {offsets = [0, 0], sizes = [2, 32], strides = [1, 1]} : vector<2x128xf32> to vector<2x32xf32>
    %362 = vector.extract_strided_slice %359 {offsets = [0, 32], sizes = [2, 32], strides = [1, 1]} : vector<2x128xf32> to vector<2x32xf32>
    %363 = vector.extract_strided_slice %360 {offsets = [0, 64], sizes = [2, 32], strides = [1, 1]} : vector<2x128xf32> to vector<2x32xf32>
    %364 = vector.extract_strided_slice %359 {offsets = [0, 96], sizes = [2, 32], strides = [1, 1]} : vector<2x128xf32> to vector<2x32xf32>
    %365 = arith.mulf %362, %348 : vector<2x32xf32>
    %366 = arith.mulf %361, %363 : vector<2x32xf32>
    %367 = arith.addf %365, %366 : vector<2x32xf32>
    %368 = math.tanh %367 : vector<2x32xf32>
    %369 = arith.mulf %364, %368 : vector<2x32xf32>
    %370 = vector.extract_strided_slice %215 {offsets = [16, 0], sizes = [2, 128], strides = [1, 1]} : vector<20x128xf32> to vector<2x128xf32>
    %371 = arith.truncf %369 : vector<2x32xf32> to vector<2x32xbf16>
    %cst_57 = arith.constant dense<0.000000e+00> : vector<2x128xf32>
    %372 = tpu.matmul %371, %16, %cst_57 {dimension_numbers = #tpu.dot_dimension_numbers<[1], [0], [0], [1], [0, 0, 1, 1], [], []>} : vector<2x32xbf16>, vector<32x128xbf16>, vector<2x128xf32> -> vector<2x128xf32>
    %373 = arith.addf %370, %372 : vector<2x128xf32>
    %374 = arith.negf %373 : vector<2x128xf32>
    %375 = math.exp %374 : vector<2x128xf32>
    %cst_58 = arith.constant 1.000000e+00 : f32
    %376 = vector.broadcast %cst_58 : f32 to vector<2x128xf32>
    %377 = arith.addf %376, %375 : vector<2x128xf32>
    %378 = arith.divf %376, %377 : vector<2x128xf32>
    %379 = math.tanh %373 : vector<2x128xf32>
    %380 = vector.extract_strided_slice %378 {offsets = [0, 0], sizes = [2, 32], strides = [1, 1]} : vector<2x128xf32> to vector<2x32xf32>
    %381 = vector.extract_strided_slice %378 {offsets = [0, 32], sizes = [2, 32], strides = [1, 1]} : vector<2x128xf32> to vector<2x32xf32>
    %382 = vector.extract_strided_slice %379 {offsets = [0, 64], sizes = [2, 32], strides = [1, 1]} : vector<2x128xf32> to vector<2x32xf32>
    %383 = vector.extract_strided_slice %378 {offsets = [0, 96], sizes = [2, 32], strides = [1, 1]} : vector<2x128xf32> to vector<2x32xf32>
    %384 = arith.mulf %381, %367 : vector<2x32xf32>
    %385 = arith.mulf %380, %382 : vector<2x32xf32>
    %386 = arith.addf %384, %385 : vector<2x32xf32>
    %387 = math.tanh %386 : vector<2x32xf32>
    %388 = arith.mulf %383, %387 : vector<2x32xf32>
    %389 = vector.extract_strided_slice %215 {offsets = [18, 0], sizes = [2, 128], strides = [1, 1]} : vector<20x128xf32> to vector<2x128xf32>
    %390 = arith.truncf %388 : vector<2x32xf32> to vector<2x32xbf16>
    %cst_59 = arith.constant dense<0.000000e+00> : vector<2x128xf32>
    %391 = tpu.matmul %390, %16, %cst_59 {dimension_numbers = #tpu.dot_dimension_numbers<[1], [0], [0], [1], [0, 0, 1, 1], [], []>} : vector<2x32xbf16>, vector<32x128xbf16>, vector<2x128xf32> -> vector<2x128xf32>
    %392 = arith.addf %389, %391 : vector<2x128xf32>
    %393 = arith.negf %392 : vector<2x128xf32>
    %394 = math.exp %393 : vector<2x128xf32>
    %cst_60 = arith.constant 1.000000e+00 : f32
    %395 = vector.broadcast %cst_60 : f32 to vector<2x128xf32>
    %396 = arith.addf %395, %394 : vector<2x128xf32>
    %397 = arith.divf %395, %396 : vector<2x128xf32>
    %398 = math.tanh %392 : vector<2x128xf32>
    %399 = vector.extract_strided_slice %397 {offsets = [0, 0], sizes = [2, 32], strides = [1, 1]} : vector<2x128xf32> to vector<2x32xf32>
    %400 = vector.extract_strided_slice %397 {offsets = [0, 32], sizes = [2, 32], strides = [1, 1]} : vector<2x128xf32> to vector<2x32xf32>
    %401 = vector.extract_strided_slice %398 {offsets = [0, 64], sizes = [2, 32], strides = [1, 1]} : vector<2x128xf32> to vector<2x32xf32>
    %402 = vector.extract_strided_slice %397 {offsets = [0, 96], sizes = [2, 32], strides = [1, 1]} : vector<2x128xf32> to vector<2x32xf32>
    %403 = arith.mulf %400, %386 : vector<2x32xf32>
    %404 = arith.mulf %399, %401 : vector<2x32xf32>
    %405 = arith.addf %403, %404 : vector<2x32xf32>
    %406 = math.tanh %405 : vector<2x32xf32>
    %407 = arith.mulf %402, %406 : vector<2x32xf32>
    %408 = tpu.concatenate %236, %255, %274, %293, %312, %331, %350, %369, %388, %407 in 0 : vector<2x32xf32>, vector<2x32xf32>, vector<2x32xf32>, vector<2x32xf32>, vector<2x32xf32>, vector<2x32xf32>, vector<2x32xf32>, vector<2x32xf32>, vector<2x32xf32>, vector<2x32xf32> -> vector<20x32xf32>
    %409 = arith.truncf %408 : vector<20x32xf32> to vector<20x32xbf16>
    %c0_61 = arith.constant 0 : index
    %c0_62 = arith.constant 0 : index
    %410 = vector.load %arg10[%c0_61, %c0_62] : memref<32x32xbf16, #tpu.memory_space<vmem>>, vector<32x32xbf16>
    %cst_63 = arith.constant dense<0.000000e+00> : vector<20x32xf32>
    %411 = tpu.matmul %409, %410, %cst_63 {dimension_numbers = #tpu.dot_dimension_numbers<[1], [0], [0], [1], [0, 0, 1, 1], [], []>} : vector<20x32xbf16>, vector<32x32xbf16>, vector<20x32xf32> -> vector<20x32xf32>
    %cst_64 = arith.constant dense<0xFF800000> : vector<20xf32>
    %412 = vector.multi_reduction <maximumf>, %411, %cst_64 [1] : vector<20x32xf32> to vector<20xf32>
    %413 = vector.shape_cast %412 : vector<20xf32> to vector<20x1xf32>
    %414 = vector.broadcast %413 : vector<20x1xf32> to vector<20x32xf32>
    %415 = arith.subf %411, %414 : vector<20x32xf32>
    %416 = math.exp %415 : vector<20x32xf32>
    %cst_65 = arith.constant dense<0.000000e+00> : vector<20xf32>
    %417 = vector.multi_reduction <add>, %416, %cst_65 [1] : vector<20x32xf32> to vector<20xf32>
    %418 = vector.shape_cast %417 : vector<20xf32> to vector<20x1xf32>
    %419 = math.log %418 : vector<20x1xf32>
    %c0_66 = arith.constant 0 : index
    %c0_67 = arith.constant 0 : index
    %420 = vector.load %arg1[%c0_66, %c0_67] : memref<20x1xi32, #tpu.memory_space<vmem>>, vector<20x1xi32>
    %421 = vector.broadcast %420 : vector<20x1xi32> to vector<20x32xi32>
    %422 = arith.cmpi eq, %0, %421 : vector<20x32xi32>
    %cst_68 = arith.constant 0.000000e+00 : f32
    %423 = vector.broadcast %cst_68 : f32 to vector<20x32xf32>
    %424 = arith.select %422, %415, %423 : vector<20x32xi1>, vector<20x32xf32>
    %cst_69 = arith.constant dense<0.000000e+00> : vector<20xf32>
    %425 = vector.multi_reduction <add>, %424, %cst_69 [1] : vector<20x32xf32> to vector<20xf32>
    %426 = vector.shape_cast %425 : vector<20xf32> to vector<20x1xf32>
    %427 = arith.subf %419, %426 : vector<20x1xf32>
    %c0_70 = arith.constant 0 : index
    %c0_71 = arith.constant 0 : index
    %428 = vector.load %arg14[%c0_70, %c0_71] : memref<20x1xf32, #tpu.memory_space<vmem>>, vector<20x1xf32>
    tpu.vector_store %arg14[%c0_70, %c0_71], %427 {strides = array<i32>} : memref<20x1xf32, #tpu.memory_space<vmem>>, vector<20x1xf32>,
    %429 = tpu.reciprocal %418 {approx = true} : vector<20x1xf32> -> vector<20x1xf32>
    %430 = vector.broadcast %429 : vector<20x1xf32> to vector<20x32xf32>
    %431 = arith.mulf %416, %430 : vector<20x32xf32>
    %c0_72 = arith.constant 0 : index
    %c0_73 = arith.constant 0 : index
    %432 = vector.load %arg11[%c0_72, %c0_73] : memref<1x32xf32, #tpu.memory_space<vmem>>, vector<1x32xf32>
    %433 = vector.broadcast %432 : vector<1x32xf32> to vector<20x32xf32>
    %434 = arith.mulf %431, %433 : vector<20x32xf32>
    %cst_74 = arith.constant dense<0.000000e+00> : vector<20xf32>
    %435 = vector.multi_reduction <add>, %434, %cst_74 [1] : vector<20x32xf32> to vector<20xf32>
    %436 = vector.shape_cast %435 : vector<20xf32> to vector<20x1xf32>
    %c0_75 = arith.constant 0 : index
    %c0_76 = arith.constant 0 : index
    %437 = vector.load %arg2[%c0_75, %c0_76] : memref<20x1xf32, #tpu.memory_space<vmem>>, vector<20x1xf32>
    %cst_77 = arith.constant 9.99999997E-7 : f32
    %438 = vector.broadcast %cst_77 : f32 to vector<20x1xf32>
    %439 = arith.maximumf %437, %438 : vector<20x1xf32>
    %440 = arith.mulf %439, %436 : vector<20x1xf32>
    %c0_78 = arith.constant 0 : index
    %c0_79 = arith.constant 0 : index
    %441 = vector.load %arg12[%c0_78, %c0_79] : memref<32x32xf32, #tpu.memory_space<vmem>>, vector<32x32xf32>
    %cst_80 = arith.constant dense<0.000000e+00> : vector<20x32xf32>
    %442 = tpu.matmul %434, %441, %cst_80 {dimension_numbers = #tpu.dot_dimension_numbers<[1], [0], [0], [1], [0, 0, 1, 1], [], []>} : vector<20x32xf32>, vector<32x32xf32>, vector<20x32xf32> -> vector<20x32xf32>
    %443 = vector.broadcast %440 : vector<20x1xf32> to vector<20x32xf32>
    %444 = arith.cmpf olt, %442, %443 : vector<20x32xf32>
    %445 = arith.extui %444 : vector<20x32xi1> to vector<20x32xi32>
    %cst_81 = arith.constant dense<0> : vector<20xi32>
    %446 = vector.multi_reduction <add>, %445, %cst_81 [1] : vector<20x32xi32> to vector<20xi32>
    %447 = vector.shape_cast %446 : vector<20xi32> to vector<20x1xi32>
    %c31_i32 = arith.constant 31 : i32
    %448 = vector.broadcast %c31_i32 : i32 to vector<20x1xi32>
    %449 = arith.minsi %447, %448 : vector<20x1xi32>
    %c0_82 = arith.constant 0 : index
    %c0_83 = arith.constant 0 : index
    %450 = vector.load %arg13[%c0_82, %c0_83] : memref<20x1xi32, #tpu.memory_space<vmem>>, vector<20x1xi32>
    tpu.vector_store %arg13[%c0_82, %c0_83], %449 {strides = array<i32>} : memref<20x1xi32, #tpu.memory_space<vmem>>, vector<20x1xi32>,
    return
  }
}

</mosaic_0001>

<bundles_post_ra>
// kernel: program_prior_forward.1
= control target key start
LH: loop header
LB: loop body
LE: loop exit
PB: predicated region body
PF: predicated region fallthrough
CT: control target
= control target key end

     0   :  { %v2081_v0 = vmov 0   ;;  %v47_v7 = vlaneseq  ;;  %v2082_v11 = vmov 0.0   ;;  %vm88_vm2 = vcmask 261120   ;;  %s2594_s0 = inlined_call_operand.vmem [shape: s32[20,1], index: 0, kind: input, shape index: {}]   ;;  %s2595_s3 = inlined_call_operand.vmem [shape: bf16[32,32], index: 3, kind: input, shape index: {}]   ;;  %s2596_s5 = inlined_call_operand.vmem [shape: bf16[32,128], index: 5, kind: input, shape index: {}]   ;;  %s2597_s6 = inlined_call_operand.vmem [shape: f32[1,128], index: 6, kind: input, shape index: {}]   ;;  %s2598_s4 = inlined_call_operand.vmem [shape: bf16[32,128], index: 4, kind: input, shape index: {}]   ;;  %s2599_s7 = inlined_call_operand.vmem [shape: bf16[32,128], index: 7, kind: input, shape index: {}]   ;;  %s2600_s8 = inlined_call_operand.vmem [shape: bf16[32,128], index: 8, kind: input, shape index: {}]   ;;  %s2601_s9 = inlined_call_operand.vmem [shape: f32[1,128], index: 9, kind: input, shape index: {}]   ;;  %s2602_s10 = inlined_call_operand.vmem [shape: bf16[32,32], index: 10, kind: input, shape index: {}]   ;;  %s2603_s11 = inlined_call_operand.vmem [shape: f32[1,32], index: 11, kind: input, shape index: {}]   ;;  %s2604_s12 = inlined_call_operand.vmem [shape: f32[32,32], index: 12, kind: input, shape index: {}]   ;;  %s2605_s1 = inlined_call_operand.vmem [shape: s32[20,1], index: 1, kind: input, shape index: {}]   ;;  %s2606_s2 = inlined_call_operand.vmem [shape: f32[20,1], index: 2, kind: input, shape index: {}]   ;;  %s2607_s13 = inlined_call_operand.vmem [shape: s32[20,1], index: 13, kind: output, shape index: {0}]   ;;  %s2608_s14 = inlined_call_operand.vmem [shape: f32[20,1], index: 14, kind: output, shape index: {1}]  }
   0x1   :  { %1897 = vset.pattern.permute.xlu0 %v2081_v0  ;;  %v49_v1 = vld [vmem:[%s2594_s0] sm:$0xff]  ;;  %1898 = vset.pattern.permute.xlu2 %v2081_v0  ;;  %v50_v2 = vld [vmem:[%s2594_s0 + $0x8] sm:$0xff]  ;;  %vm809_vm15 = vcmask 1041408  }
   0x2   :  { %53 = vperm.xlu0 %1897, %v49_v1   ;;  %1899 = vset.pattern.permute.xlu1 %v2081_v0  ;;  %v1882_v3 = vld [vmem:[%s2595_s3 + $0x8] sm:$0xff]  ;;  %v1881_v4 = vld [vmem:[%s2595_s3] sm:$0xff]  ;;  %v2198_v9 = vand.u32 127, %v47_v7 }
   0x3   :  { %101 = vmatpush.bf16.msra.mxu0 %v1882_v3  ;;  %v2178_v5 = vld [vmem:[%s2596_s5 + $0x8] sm:$0xff]  ;;  %v2184_v6 = vld [vmem:[%s2596_s5] sm:$0xff] }
   0x4   :  { %188 = vmatpush.bf16.msra.mxu2 %v2178_v5  ;;  %246 = vmatpush.bf16.msra.mxu3 %v2178_v5  ;;  %v1884_v15 = vld [vmem:[%s2598_s4 + $0x8] sm:$0xff]  ;;  %v1883_v16 = vld [vmem:[%s2598_s4] sm:$0xff]  ;;  %s2083_s4 = smov 64  }
   0x5   :  { %147 = vmatpush.bf16.msra.mxu1 %v1884_v15  ;;  %v2221_v22 = vld [vmem:[%s2597_s6] ss:$0 sm:$0xff]  ;;  %s2084_s6 = smov 32  }
   0x7   :  { %102 = vmatpush.bf16.msra.mxu0 %v1881_v4 }
   0x8   :  { %189 = vmatpush.bf16.msra.mxu2 %v2184_v6  ;;  %247 = vmatpush.bf16.msra.mxu3 %v2184_v6 }
   0x9   :  { %148 = vmatpush.bf16.msra.mxu1 %v1883_v16 }
   0xa   :  { %56 = vperm.xlu0 %1897, %v50_v2  }
   0xb   :  { %441 = vmatpush.bf16.msrb.mxu0 %v2178_v5  ;;  %190 = vmatmul.bf16.vlgmr.msra.gmra.mxu2 %v2081_v0 }
   0xc   :  { %311 = vmatpush.bf16.msrb.mxu2 %v2178_v5  ;;  %376 = vmatpush.bf16.msrb.mxu3 %v2178_v5 }
   0xd   :  { %502 = vmatpush.bf16.msrb.mxu1 %v2178_v5 }
   0xf   :  { %442 = vmatpush.bf16.msrb.mxu0 %v2184_v6 }
  0x10   :  { %312 = vmatpush.bf16.msrb.mxu2 %v2184_v6  ;;  %377 = vmatpush.bf16.msrb.mxu3 %v2184_v6 }
  0x11   :  { %503 = vmatpush.bf16.msrb.mxu1 %v2184_v6 }
  0x14   :  { %567 = vmatpush.bf16.msra.mxu2 %v2178_v5 }
  0x18   :  { %568 = vmatpush.bf16.msra.mxu2 %v2184_v6 }
  0x74   :  { %v54_v8 = vpop.permute.xlu0 %53 }
  0x75   :  { %vm61_vm0 = vcmp.eq.s32.totalorder %v2198_v9, %v54_v8 }
  0x76   :  { %v1781_v12 = vsel %vm61_vm0, 1.0, %v2082_v11  ;;  %vm811_vm0 = vcmask 1043456  }
  0x7c   :  { %v57_v10 = vpop.permute.xlu0 %56 }
  0x7d   :  { %vm62_vm1 = vcmp.eq.s32.totalorder %v2198_v9, %v57_v10 }
  0x7e   :  { %v1782_v13 = vsel %vm62_vm1, 1.0, %v2082_v11 }
  0x7f   :  { %v70_v14 = vpack.c.bf16 %v1782_v13, %v1781_v12 }
  0x81   :  { %1792 = vmatmul.msk.bf16.vlgmr.msra.gmra.mxu0 %vm88_vm2, %v70_v14 }
  0x82   :  { %697 = vmatpush.bf16.msra.mxu0 %v2178_v5 }
  0x86   :  { %698 = vmatpush.bf16.msra.mxu0 %v2184_v6 }
  0x8e   :  { %v191_v17 = vpop.f32.mrf.mxu2 }
  0x96   :  { %v193_v18 = vpop.f32.mrf.mxu2 }
  0xfe   :  { %v104_v19 = vpop.f32.mrf.mxu0 }
 0x106   :  { %v106_v20 = vpop.f32.mrf.mxu0 }
 0x107   :  { %v113_v21 = vpack.c.bf16 %v106_v20, %v104_v19 }
 0x109   :  { %1802 = vmatmul.msk.bf16.vlgmr.msra.gmra.mxu1 %vm88_vm2, %v113_v21 }
 0x10a   :  { %758 = vmatpush.bf16.msra.mxu1 %v2178_v5 }
 0x10e   :  { %759 = vmatpush.bf16.msra.mxu1 %v2184_v6 }
 0x186   :  { %v150_v23 = vpop.f32.mrf.mxu1 }
 0x187   :  { %v2224_v24 = vadd.f32 %v2221_v22, %v150_v23 }
 0x189   :  { %v195_v25 = vadd.f32 %v191_v17, %v2224_v24 }
 0x18b   :  { %1903 = vtanh.f32 %v195_v25  ;;  %v1812_v27 = vmul.f32 -1.442695, %v195_v25 }
 0x18d   :  { %1905 = vpow2.f32 %v1812_v27 }
 0x191   :  { %v1904_v26 = vpop.eup %1903 }
 0x192   :  { %218 = vrot.lane.b32.xlu1 %v1904_v26, %s2083_s4 }
 0x193   :  { %v1906_v28 = vpop.eup %1905 }
 0x194   :  { %v199_v29 = vadd.f32 1.0, %v1906_v28 }
 0x196   :  { %1907 = vrcp.f32 %v199_v29  ;;  %v211_v35 = vand.u32 2147483648, %v199_v29  ;;  %vm205_vm4 = vweird.f32 %v199_v29  ;;  %v209_v36 = vand.u32 2147483647, %v199_v29 }
 0x198   :  { %v212_v38 = vor.u32 1.1754944e-38, %v211_v35  ;;  %vm210_vm6 = vcmp.eq.f32.partialorder %v209_v36, 8.507059e+37 }
 0x19c   :  { %v1908_v30 = vpop.eup %1907 }
 0x19d   :  { %v201_v31 = vmul.f32 %v1908_v30, %v199_v29  ;;  %vm206_vm3 = vweird.f32 %v1908_v30 }
 0x19e   :  { %vm207_vm5 = vmor %vm205_vm4, %vm206_vm3 }
 0x19f   :  { %v202_v32 = vsub.f32 1.0, %v201_v31 }
 0x1a1   :  { %v203_v33 = vmul.f32 %v1908_v30, %v202_v32 }
 0x1a3   :  { %v204_v34 = vadd.f32 %v1908_v30, %v203_v33 }
 0x1a5   :  { %v208_v37 = vsel %vm207_vm5, %v1908_v30, %v204_v34 }
 0x1a6   :  { %v213_v40 = vsel %vm210_vm6, %v212_v38, %v208_v37  ;;  %vm813_vm6 = vcmask 1045504  }
 0x1a7   :  { %v216_v42 = vmul.f32 0.0, %v213_v40 }
 0x204   :  { %v219_v39 = vpop.permute.xlu1 %218 }
 0x205   :  { %v221_v41 = vmul.f32 %v219_v39, %v213_v40 }
 0x207   :  { %223 = vrot.lane.b32.xlu1 %v221_v41, %s2084_s6 }
 0x279   :  { %v224_v43 = vpop.permute.xlu1 %223 }
 0x27a   :  { %v226_v44 = vadd.f32 %v224_v43, %v216_v42 }
 0x27c   :  { %1909 = vtanh.f32 %v226_v44  ;;  %v278_v7 = vrot.slane %v226_v44, 6 }
 0x282   :  { %v1910_v45 = vpop.eup %1909 }
 0x283   :  { %229 = vrot.lane.b32.xlu2 %v1910_v45, %s2083_s4 }
 0x2dd   :  { %v230_v46 = vpop.permute.xlu2 %229 }
 0x2de   :  { %v2230_v47 = vmul.f32 %v230_v46, %v213_v40 }
 0x2e0   :  { %v233_v48 = vpack.c.bf16 %v2230_v47, %v2230_v47 }
 0x2e2   :  { %235 = vrot.lane.b32.xlu2 %v233_v48, %s2084_s6 }
 0x33c   :  { %v236_v49 = vpop.permute.xlu2 %235 }
 0x33d   :  { %1813 = vmatmul.msk.bf16.vlgmr.msra.gmra.mxu3 %vm88_vm2, %v236_v49 }
 0x33e   :  { %632 = vmatpush.bf16.msra.mxu3 %v2178_v5 }
 0x342   :  { %633 = vmatpush.bf16.msra.mxu3 %v2184_v6 }
 0x3c0   :  { %v249_v50 = vpop.f32.mrf.mxu3 }
 0x3c1   :  { %v254_v51 = vrot.slane %v249_v50, 6 }
 0x3c3   :  { %v256_v52 = vadd.f32 %v254_v51, %v2224_v24 }
 0x3c5   :  { %1911 = vtanh.f32 %v256_v52  ;;  %v1814_v55 = vmul.f32 -1.442695, %v256_v52 }
 0x3c7   :  { %1913 = vpow2.f32 %v1814_v55 }
 0x3c8   :  { %v251_v53 = vpop.f32.mrf.mxu3 }
 0x3cb   :  { %v1912_v54 = vpop.eup %1911 }
 0x3cc   :  { %282 = vrot.lane.b32.xlu0 %v1912_v54, %s2083_s4 }
 0x3cd   :  { %v1914_v56 = vpop.eup %1913 }
 0x3ce   :  { %v260_v57 = vadd.f32 1.0, %v1914_v56 }
 0x3d0   :  { %1915 = vrcp.f32 %v260_v57  ;;  %v272_v63 = vand.u32 2147483648, %v260_v57  ;;  %vm266_vm8 = vweird.f32 %v260_v57  ;;  %v270_v1 = vand.u32 2147483647, %v260_v57 }
 0x3d2   :  { %v273_v3 = vor.u32 1.1754944e-38, %v272_v63  ;;  %vm271_vm10 = vcmp.eq.f32.partialorder %v270_v1, 8.507059e+37 }
 0x3d6   :  { %v1916_v58 = vpop.eup %1915 }
 0x3d7   :  { %v262_v59 = vmul.f32 %v1916_v58, %v260_v57  ;;  %vm267_vm7 = vweird.f32 %v1916_v58 }
 0x3d8   :  { %vm268_vm9 = vmor %vm266_vm8, %vm267_vm7 }
 0x3d9   :  { %v263_v60 = vsub.f32 1.0, %v262_v59 }
 0x3db   :  { %v264_v61 = vmul.f32 %v1916_v58, %v263_v60 }
 0x3dd   :  { %v265_v62 = vadd.f32 %v1916_v58, %v264_v61 }
 0x3df   :  { %v269_v2 = vsel %vm268_vm9, %v1916_v58, %v265_v62 }
 0x3e0   :  { %v274_v5 = vsel %vm271_vm10, %v273_v3, %v269_v2 }
 0x3e1   :  { %v280_v8 = vmul.f32 %v278_v7, %v274_v5 }
 0x43e   :  { %v283_v4 = vpop.permute.xlu0 %282 }
 0x43f   :  { %v285_v6 = vmul.f32 %v283_v4, %v274_v5 }
 0x441   :  { %287 = vrot.lane.b32.xlu1 %v285_v6, %s2084_s6 }
 0x4b3   :  { %v288_v10 = vpop.permute.xlu1 %287 }
 0x4b4   :  { %v290_v12 = vadd.f32 %v288_v10, %v280_v8 }
 0x4b6   :  { %1917 = vtanh.f32 %v290_v12  ;;  %v343_v41 = vrot.slane %v290_v12, 6 }
 0x4bc   :  { %v1918_v13 = vpop.eup %1917 }
 0x4bd   :  { %293 = vrot.lane.b32.xlu2 %v1918_v13, %s2083_s4 }
 0x517   :  { %v294_v14 = vpop.permute.xlu2 %293 }
 0x518   :  { %v296_v15 = vmul.f32 %v294_v14, %v274_v5 }
 0x51a   :  { %v297_v16 = vpack.c.bf16 %v296_v15, %v296_v15  ;;  %v810_v49 = vsel %vm809_vm15, %v2230_v47, %v296_v15 }
 0x51c   :  { %v299_v17 = vrot.slane %v297_v16, 1  ;;  %v51_v16 = vld [vmem:[%s2594_s0 + $0x10] sm:$0xf] }
 0x51e   :  { %300 = vrot.lane.b32.xlu0 %v299_v17, %s2084_s6 }
 0x590   :  { %v301_v18 = vpop.permute.xlu0 %300 }
 0x591   :  { %1815 = vmatmul.msk.bf16.vlgmr.msrb.gmra.mxu2 %vm88_vm2, %v301_v18 }
 0x614   :  { %v314_v19 = vpop.f32.mrf.mxu2 }
 0x615   :  { %v319_v20 = vrot.slane %v314_v19, 4 }
 0x617   :  { %v321_v21 = vadd.f32 %v319_v20, %v2224_v24 }
 0x619   :  { %1919 = vtanh.f32 %v321_v21  ;;  %v1816_v26 = vmul.f32 -1.442695, %v321_v21 }
 0x61b   :  { %1921 = vpow2.f32 %v1816_v26 }
 0x61c   :  { %v316_v23 = vpop.f32.mrf.mxu2 }
 0x61f   :  { %v1920_v25 = vpop.eup %1919 }
 0x620   :  { %347 = vrot.lane.b32.xlu1 %v1920_v25, %s2083_s4 }
 0x621   :  { %v1922_v27 = vpop.eup %1921 }
 0x622   :  { %v325_v28 = vadd.f32 1.0, %v1922_v27 }
 0x624   :  { %1923 = vrcp.f32 %v325_v28  ;;  %v337_v34 = vand.u32 2147483648, %v325_v28  ;;  %vm331_vm12 = vweird.f32 %v325_v28  ;;  %v335_v35 = vand.u32 2147483647, %v325_v28 }
 0x626   :  { %v338_v37 = vor.u32 1.1754944e-38, %v337_v34  ;;  %vm336_vm14 = vcmp.eq.f32.partialorder %v335_v35, 8.507059e+37 }
 0x62a   :  { %v1924_v29 = vpop.eup %1923 }
 0x62b   :  { %v327_v30 = vmul.f32 %v1924_v29, %v325_v28  ;;  %vm332_vm11 = vweird.f32 %v1924_v29 }
 0x62c   :  { %vm333_vm13 = vmor %vm331_vm12, %vm332_vm11 }
 0x62d   :  { %v328_v31 = vsub.f32 1.0, %v327_v30 }
 0x62f   :  { %v329_v32 = vmul.f32 %v1924_v29, %v328_v31  ;;  %v152_v31 = vpop.f32.mrf.mxu1 }
 0x631   :  { %v330_v33 = vadd.f32 %v1924_v29, %v329_v32  ;;  %v2270_v32 = vadd.f32 %v2221_v22, %v152_v31 }
 0x633   :  { %v334_v36 = vsel %vm333_vm13, %v1924_v29, %v330_v33 }
 0x634   :  { %v339_v39 = vsel %vm336_vm14, %v338_v37, %v334_v36 }
 0x635   :  { %v345_v42 = vmul.f32 %v343_v41, %v339_v39 }
 0x692   :  { %v348_v38 = vpop.permute.xlu1 %347 }
 0x693   :  { %v350_v40 = vmul.f32 %v348_v38, %v339_v39 }
 0x695   :  { %352 = vrot.lane.b32.xlu2 %v350_v40, %s2084_s6 }
 0x6ef   :  { %v353_v43 = vpop.permute.xlu2 %352 }
 0x6f0   :  { %v355_v44 = vadd.f32 %v353_v43, %v345_v42 }
 0x6f2   :  { %1925 = vtanh.f32 %v355_v44  ;;  %v408_v10 = vrot.slane %v355_v44, 6 }
 0x6f8   :  { %v1926_v45 = vpop.eup %1925 }
 0x6f9   :  { %358 = vrot.lane.b32.xlu0 %v1926_v45, %s2083_s4 }
 0x76b   :  { %v359_v46 = vpop.permute.xlu0 %358 }
 0x76c   :  { %v361_v48 = vmul.f32 %v359_v46, %v339_v39 }
 0x76e   :  { %v362_v50 = vpack.c.bf16 %v361_v48, %v361_v48  ;;  %v812_v51 = vsel %vm811_vm0, %v810_v49, %v361_v48 }
 0x770   :  { %v364_v52 = vrot.slane %v362_v50, 2 }
 0x772   :  { %365 = vrot.lane.b32.xlu1 %v364_v52, %s2084_s6 }
 0x7e4   :  { %v366_v53 = vpop.permute.xlu1 %365 }
 0x7e5   :  { %1817 = vmatmul.msk.bf16.vlgmr.msrb.gmra.mxu3 %vm88_vm2, %v366_v53 }
 0x868   :  { %v379_v54 = vpop.f32.mrf.mxu3 }
 0x869   :  { %v384_v55 = vrot.slane %v379_v54, 2 }
 0x86b   :  { %v386_v56 = vadd.f32 %v384_v55, %v2224_v24 }
 0x86d   :  { %1927 = vtanh.f32 %v386_v56  ;;  %v1818_v59 = vmul.f32 -1.442695, %v386_v56 }
 0x86f   :  { %1929 = vpow2.f32 %v1818_v59 }
 0x870   :  { %v381_v57 = vpop.f32.mrf.mxu3 }
 0x873   :  { %v1928_v58 = vpop.eup %1927 }
 0x874   :  { %412 = vrot.lane.b32.xlu2 %v1928_v58, %s2083_s4 }
 0x875   :  { %v1930_v47 = vpop.eup %1929 }
 0x876   :  { %v390_v60 = vadd.f32 1.0, %v1930_v47 }
 0x878   :  { %1931 = vrcp.f32 %v390_v60  ;;  %v402_v3 = vand.u32 2147483648, %v390_v60  ;;  %vm396_vm3 = vweird.f32 %v390_v60  ;;  %v400_v4 = vand.u32 2147483647, %v390_v60 }
 0x87a   :  { %v403_v5 = vor.u32 1.1754944e-38, %v402_v3  ;;  %vm401_vm5 = vcmp.eq.f32.partialorder %v400_v4, 8.507059e+37 }
 0x87c   :  { %59 = vperm.xlu2 %1898, %v51_v16  }
 0x87e   :  { %v1932_v61 = vpop.eup %1931 }
 0x87f   :  { %v392_v62 = vmul.f32 %v1932_v61, %v390_v60  ;;  %vm397_vm1 = vweird.f32 %v1932_v61 }
 0x880   :  { %vm398_vm4 = vmor %vm396_vm3, %vm397_vm1 }
 0x881   :  { %v393_v63 = vsub.f32 1.0, %v392_v62 }
 0x883   :  { %v394_v1 = vmul.f32 %v1932_v61, %v393_v63 }
 0x885   :  { %v395_v2 = vadd.f32 %v1932_v61, %v394_v1 }
 0x887   :  { %v399_v24 = vsel %vm398_vm4, %v1932_v61, %v395_v2 }
 0x888   :  { %v404_v7 = vsel %vm401_vm5, %v403_v5, %v399_v24 }
 0x889   :  { %v410_v12 = vmul.f32 %v408_v10, %v404_v7 }
 0x8ce   :  { %v413_v6 = vpop.permute.xlu2 %412 }
 0x8cf   :  { %v415_v8 = vmul.f32 %v413_v6, %v404_v7 }
 0x8d1   :  { %417 = vrot.lane.b32.xlu0 %v415_v8, %s2084_s6 }
 0x8d6   :  { %v60_v23 = vpop.permute.xlu2 %59 }
 0x8d7   :  { %vm63_vm7 = vcmp.eq.s32.totalorder %v2198_v9, %v60_v23 }
 0x8d8   :  { %v1783_v25 = vsel %vm63_vm7, 1.0, %v2082_v11 }
 0x8d9   :  { %v71_v26 = vpack.c.bf16 %v1783_v25, %v1783_v25 }
 0x8db   :  { %1793 = vmatmul.msk.bf16.gmra.mxu0 %vm88_vm2, %v71_v26 }
 0x943   :  { %v418_v13 = vpop.permute.xlu0 %417 }
 0x944   :  { %v420_v14 = vadd.f32 %v418_v13, %v410_v12 }
 0x946   :  { %1933 = vtanh.f32 %v420_v14  ;;  %v470_v54 = vrot.slane %v420_v14, 6 }
 0x94c   :  { %v1934_v15 = vpop.eup %1933 }
 0x94d   :  { %423 = vrot.lane.b32.xlu1 %v1934_v15, %s2083_s4 }
 0x958   :  { %v109_v28 = vpop.f32.mrf.mxu0 }
 0x959   :  { %v114_v29 = vpack.c.bf16 %v109_v28, %v109_v28 }
 0x95b   :  { %1803 = vmatmul.msk.bf16.gmra.mxu1 %vm88_vm2, %v114_v29 }
 0x960   :  { %v111_v30 = vpop.f32.mrf.mxu0 }
 0x9bf   :  { %v424_v17 = vpop.permute.xlu1 %423 }
 0x9c0   :  { %v426_v18 = vmul.f32 %v424_v17, %v404_v7 }
 0x9c2   :  { %v427_v19 = vpack.c.bf16 %v426_v18, %v426_v18  ;;  %v2261_v20 = vsel %vm813_vm6, %v812_v51, %v426_v18 }
 0x9c4   :  { %v429_v21 = vrot.slane %v427_v19, 3 }
 0x9c6   :  { %430 = vrot.lane.b32.xlu0 %v429_v21, %s2084_s6 }
 0x9d8   :  { %v2274_v36 = vpop.f32.mrf.mxu1 }
 0x9e0   :  { %v157_v38 = vpop.f32.mrf.mxu1 }
 0xa38   :  { %v431_v27 = vpop.permute.xlu0 %430 }
 0xa39   :  { %1819 = vmatmul.msk.bf16.vlgmr.msrb.gmra.mxu0 %vm88_vm2, %v431_v27 }
 0xab6   :  { %v444_v33 = vpop.f32.mrf.mxu0 }
 0xab7   :  { %v448_v34 = vadd.f32 %v444_v33, %v2270_v32 }
 0xab9   :  { %1935 = vtanh.f32 %v448_v34  ;;  %v1820_v37 = vmul.f32 -1.442695, %v448_v34 }
 0xabb   :  { %1937 = vpow2.f32 %v1820_v37 }
 0xabe   :  { %v446_v11 = vpop.f32.mrf.mxu0 }
 0xabf   :  { %v1936_v35 = vpop.eup %1935 }
 0xac0   :  { %474 = vrot.lane.b32.xlu1 %v1936_v35, %s2083_s4 }
 0xac1   :  { %v1938_v39 = vpop.eup %1937 }
 0xac2   :  { %v452_v40 = vadd.f32 1.0, %v1938_v39 }
 0xac4   :  { %1939 = vrcp.f32 %v452_v40  ;;  %v464_v46 = vand.u32 2147483648, %v452_v40  ;;  %vm458_vm9 = vweird.f32 %v452_v40  ;;  %v462_v48 = vand.u32 2147483647, %v452_v40 }
 0xac6   :  { %v465_v50 = vor.u32 1.1754944e-38, %v464_v46  ;;  %vm463_vm11 = vcmp.eq.f32.partialorder %v462_v48, 8.507059e+37 }
 0xaca   :  { %v1940_v41 = vpop.eup %1939 }
 0xacb   :  { %v454_v42 = vmul.f32 %v1940_v41, %v452_v40  ;;  %vm459_vm8 = vweird.f32 %v1940_v41 }
 0xacc   :  { %vm460_vm10 = vmor %vm458_vm9, %vm459_vm8 }
 0xacd   :  { %v455_v43 = vsub.f32 1.0, %v454_v42 }
 0xacf   :  { %v456_v44 = vmul.f32 %v1940_v41, %v455_v43 }
 0xad1   :  { %v457_v45 = vadd.f32 %v1940_v41, %v456_v44 }
 0xad3   :  { %v461_v49 = vsel %vm460_vm10, %v1940_v41, %v457_v45 }
 0xad4   :  { %v466_v52 = vsel %vm463_vm11, %v465_v50, %v461_v49 }
 0xad5   :  { %v472_v55 = vmul.f32 %v470_v54, %v466_v52 }
 0xb32   :  { %v475_v51 = vpop.permute.xlu1 %474 }
 0xb33   :  { %v477_v53 = vmul.f32 %v475_v51, %v466_v52 }
 0xb35   :  { %479 = vrot.lane.b32.xlu2 %v477_v53, %s2084_s6 }
 0xb8f   :  { %v480_v56 = vpop.permute.xlu2 %479 }
 0xb90   :  { %v482_v57 = vadd.f32 %v480_v56, %v472_v55 }
 0xb92   :  { %1941 = vtanh.f32 %v482_v57  ;;  %v534_v21 = vrot.slane %v482_v57, 6 }
 0xb98   :  { %v1942_v58 = vpop.eup %1941 }
 0xb99   :  { %485 = vrot.lane.b32.xlu0 %v1942_v58, %s2083_s4 }
 0xc0b   :  { %v486_v59 = vpop.permute.xlu0 %485 }
 0xc0c   :  { %v2278_v47 = vmul.f32 %v486_v59, %v466_v52 }
 0xc0e   :  { %v489_v60 = vpack.c.bf16 %v2278_v47, %v2278_v47 }
 0xc10   :  { %491 = vrot.lane.b32.xlu1 %v489_v60, %s2084_s6 }
 0xc82   :  { %v492_v61 = vpop.permute.xlu1 %491 }
 0xc83   :  { %1821 = vmatmul.msk.bf16.vlgmr.msrb.gmra.mxu1 %vm88_vm2, %v492_v61 }
 0xd00   :  { %v505_v62 = vpop.f32.mrf.mxu1 }
 0xd01   :  { %v510_v63 = vrot.slane %v505_v62, 6 }
 0xd03   :  { %v512_v1 = vadd.f32 %v510_v63, %v2270_v32 }
 0xd05   :  { %1943 = vtanh.f32 %v512_v1  ;;  %v1822_v4 = vmul.f32 -1.442695, %v512_v1 }
 0xd07   :  { %1945 = vpow2.f32 %v1822_v4 }
 0xd08   :  { %v507_v2 = vpop.f32.mrf.mxu1 }
 0xd0b   :  { %v1944_v3 = vpop.eup %1943 }
 0xd0c   :  { %538 = vrot.lane.b32.xlu2 %v1944_v3, %s2083_s4 }
 0xd0d   :  { %v1946_v24 = vpop.eup %1945 }
 0xd0e   :  { %v516_v5 = vadd.f32 1.0, %v1946_v24 }
 0xd10   :  { %1947 = vrcp.f32 %v516_v5  ;;  %v528_v13 = vand.u32 2147483648, %v516_v5  ;;  %vm522_vm13 = vweird.f32 %v516_v5  ;;  %v526_v14 = vand.u32 2147483647, %v516_v5 }
 0xd12   :  { %v529_v16 = vor.u32 1.1754944e-38, %v528_v13  ;;  %vm527_vm1 = vcmp.eq.f32.partialorder %v526_v14, 8.507059e+37 }
 0xd16   :  { %v1948_v6 = vpop.eup %1947 }
 0xd17   :  { %v518_v7 = vmul.f32 %v1948_v6, %v516_v5  ;;  %vm523_vm12 = vweird.f32 %v1948_v6 }
 0xd18   :  { %vm524_vm14 = vmor %vm522_vm13, %vm523_vm12 }
 0xd19   :  { %v519_v8 = vsub.f32 1.0, %v518_v7 }
 0xd1b   :  { %v520_v10 = vmul.f32 %v1948_v6, %v519_v8 }
 0xd1d   :  { %v521_v12 = vadd.f32 %v1948_v6, %v520_v10 }
 0xd1f   :  { %v525_v15 = vsel %vm524_vm14, %v1948_v6, %v521_v12 }
 0xd20   :  { %v530_v18 = vsel %vm527_vm1, %v529_v16, %v525_v15 }
 0xd21   :  { %v536_v23 = vmul.f32 %v534_v21, %v530_v18 }
 0xd66   :  { %v539_v17 = vpop.permute.xlu2 %538 }
 0xd67   :  { %v541_v19 = vmul.f32 %v539_v17, %v530_v18 }
 0xd69   :  { %543 = vrot.lane.b32.xlu0 %v541_v19, %s2084_s6 }
 0xddb   :  { %v544_v25 = vpop.permute.xlu0 %543 }
 0xddc   :  { %v546_v26 = vadd.f32 %v544_v25, %v536_v23 }
 0xdde   :  { %1949 = vtanh.f32 %v546_v26  ;;  %v599_v55 = vrot.slane %v546_v26, 6 }
 0xde4   :  { %v1950_v27 = vpop.eup %1949 }
 0xde5   :  { %549 = vrot.lane.b32.xlu1 %v1950_v27, %s2083_s4 }
 0xe57   :  { %v550_v28 = vpop.permute.xlu1 %549 }
 0xe58   :  { %v552_v29 = vmul.f32 %v550_v28, %v530_v18 }
 0xe5a   :  { %v553_v30 = vpack.c.bf16 %v552_v29, %v552_v29  ;;  %v815_v62 = vsel %vm809_vm15, %v2278_v47, %v552_v29 }
 0xe5c   :  { %v555_v31 = vrot.slane %v553_v30, 1 }
 0xe5e   :  { %556 = vrot.lane.b32.xlu2 %v555_v31, %s2084_s6  ;;  %v1890_v31 = vld [vmem:[%s2599_s7 + $0x8] sm:$0xff] }
 0xe5f   :  { %859 = vmatpush.bf16.msrb.mxu2 %v1890_v31 }
 0xeb8   :  { %v557_v33 = vpop.permute.xlu2 %556 }
 0xeb9   :  { %1823 = vmatmul.msk.bf16.vlgmr.msra.gmra.mxu2 %vm88_vm2, %v557_v33  ;;  %v2314_v33 = vld [vmem:[%s2600_s8 + $0x8] sm:$0xff] }
 0xeba   :  { %889 = vmatpush.bf16.msrb.mxu3 %v2314_v33  ;;  %947 = vmatpush.bf16.msrb.mxu0 %v2314_v33 }
 0xebb   :  { %1012 = vmatpush.bf16.msrb.mxu1 %v2314_v33 }
 0xf3c   :  { %v570_v34 = vpop.f32.mrf.mxu2 }
 0xf3d   :  { %v575_v11 = vrot.slane %v570_v34, 4  ;;  %v2320_v34 = vld [vmem:[%s2600_s8] sm:$0xff] }
 0xf3e   :  { %890 = vmatpush.bf16.msrb.mxu3 %v2320_v34  ;;  %948 = vmatpush.bf16.msrb.mxu0 %v2320_v34 }
 0xf3f   :  { %v577_v35 = vadd.f32 %v575_v11, %v2270_v32  ;;  %v1889_v11 = vld [vmem:[%s2599_s7] sm:$0xff]  ;;  %1013 = vmatpush.bf16.msrb.mxu1 %v2320_v34 }
 0xf40   :  { %860 = vmatpush.bf16.msrb.mxu2 %v1889_v11 }
 0xf41   :  { %1951 = vtanh.f32 %v577_v35  ;;  %v1824_v39 = vmul.f32 -1.442695, %v577_v35 }
 0xf43   :  { %1953 = vpow2.f32 %v1824_v39 }
 0xf44   :  { %v572_v37 = vpop.f32.mrf.mxu2  ;;  %1268 = vmatpush.bf16.msra.mxu2 %v2314_v33 }
 0xf47   :  { %v1952_v38 = vpop.eup %1951 }
 0xf48   :  { %603 = vrot.lane.b32.xlu0 %v1952_v38, %s2083_s4  ;;  %1269 = vmatpush.bf16.msra.mxu2 %v2320_v34 }
 0xf49   :  { %v1954_v40 = vpop.eup %1953 }
 0xf4a   :  { %v581_v41 = vadd.f32 1.0, %v1954_v40 }
 0xf4c   :  { %1955 = vrcp.f32 %v581_v41  ;;  %v593_v48 = vand.u32 2147483648, %v581_v41  ;;  %vm587_vm4 = vweird.f32 %v581_v41  ;;  %v591_v49 = vand.u32 2147483647, %v581_v41 }
 0xf4e   :  { %v594_v51 = vor.u32 1.1754944e-38, %v593_v48  ;;  %vm592_vm7 = vcmp.eq.f32.partialorder %v591_v49, 8.507059e+37 }
 0xf52   :  { %v1956_v42 = vpop.eup %1955 }
 0xf53   :  { %v583_v43 = vmul.f32 %v1956_v42, %v581_v41  ;;  %vm588_vm3 = vweird.f32 %v1956_v42 }
 0xf54   :  { %vm589_vm5 = vmor %vm587_vm4, %vm588_vm3 }
 0xf55   :  { %v584_v44 = vsub.f32 1.0, %v583_v43  ;;  %v2345_v43 = vld [vmem:[%s2601_s9] ss:$0 sm:$0xff] }
 0xf57   :  { %v585_v45 = vmul.f32 %v1956_v42, %v584_v44 }
 0xf59   :  { %v586_v46 = vadd.f32 %v1956_v42, %v585_v45 }
 0xf5b   :  { %v590_v50 = vsel %vm589_vm5, %v1956_v42, %v586_v46 }
 0xf5c   :  { %v595_v53 = vsel %vm592_vm7, %v594_v51, %v590_v50 }
 0xf5d   :  { %v601_v56 = vmul.f32 %v599_v55, %v595_v53 }
 0xfba   :  { %v604_v52 = vpop.permute.xlu0 %603 }
 0xfbb   :  { %v606_v54 = vmul.f32 %v604_v52, %v595_v53 }
 0xfbd   :  { %608 = vrot.lane.b32.xlu1 %v606_v54, %s2084_s6 }
0x102f   :  { %v609_v57 = vpop.permute.xlu1 %608 }
0x1030   :  { %v611_v58 = vadd.f32 %v609_v57, %v601_v56 }
0x1032   :  { %1957 = vtanh.f32 %v611_v58  ;;  %v664_v26 = vrot.slane %v611_v58, 6 }
0x1038   :  { %v1958_v59 = vpop.eup %1957 }
0x1039   :  { %614 = vrot.lane.b32.xlu2 %v1958_v59, %s2083_s4 }
0x1093   :  { %v615_v60 = vpop.permute.xlu2 %614 }
0x1094   :  { %v617_v61 = vmul.f32 %v615_v60, %v595_v53 }
0x1096   :  { %v618_v63 = vpack.c.bf16 %v617_v61, %v617_v61  ;;  %v2297_v1 = vsel %vm811_vm0, %v815_v62, %v617_v61 }
0x1098   :  { %v620_v2 = vrot.slane %v618_v63, 2 }
0x109a   :  { %621 = vrot.lane.b32.xlu0 %v620_v2, %s2084_s6 }
0x110c   :  { %v622_v3 = vpop.permute.xlu0 %621 }
0x110d   :  { %1825 = vmatmul.msk.bf16.vlgmr.msra.gmra.mxu3 %vm88_vm2, %v622_v3 }
0x110e   :  { %1077 = vmatpush.bf16.msra.mxu3 %v2314_v33 }
0x1112   :  { %1078 = vmatpush.bf16.msra.mxu3 %v2320_v34 }
0x111d   :  { %891 = vmatmul.bf16.vlgmr.msrb.gmra.mxu3 %v2081_v0 }
0x111e   :  { %1333 = vmatpush.bf16.msrb.mxu3 %v2314_v33 }
0x1122   :  { %1334 = vmatpush.bf16.msrb.mxu3 %v2320_v34 }
0x1190   :  { %v635_v4 = vpop.f32.mrf.mxu3 }
0x1191   :  { %v640_v24 = vrot.slane %v635_v4, 2 }
0x1193   :  { %v642_v5 = vadd.f32 %v640_v24, %v2270_v32 }
0x1195   :  { %1959 = vtanh.f32 %v642_v5  ;;  %v1826_v47 = vmul.f32 -1.442695, %v642_v5 }
0x1197   :  { %1961 = vpow2.f32 %v1826_v47 }
0x1198   :  { %v637_v6 = vpop.f32.mrf.mxu3 }
0x1199   :  { %v2363_v6 = vadd.f32 %v2221_v22, %v2274_v36 }
0x119b   :  { %v1960_v7 = vpop.eup %1959 }
0x119c   :  { %668 = vrot.lane.b32.xlu1 %v1960_v7, %s2083_s4 }
0x119d   :  { %v1962_v8 = vpop.eup %1961 }
0x119e   :  { %v646_v10 = vadd.f32 1.0, %v1962_v8 }
0x11a0   :  { %1963 = vrcp.f32 %v646_v10  ;;  %v658_v17 = vand.u32 2147483648, %v646_v10  ;;  %vm652_vm9 = vweird.f32 %v646_v10  ;;  %v656_v18 = vand.u32 2147483647, %v646_v10  ;;  %v892_v40 = vpop.f32.mrf.mxu3 }
0x11a2   :  { %v659_v19 = vor.u32 1.1754944e-38, %v658_v17  ;;  %vm657_vm11 = vcmp.eq.f32.partialorder %v656_v18, 8.507059e+37 }
0x11a6   :  { %v1964_v12 = vpop.eup %1963 }
0x11a7   :  { %v648_v13 = vmul.f32 %v1964_v12, %v646_v10  ;;  %vm653_vm8 = vweird.f32 %v1964_v12 }
0x11a8   :  { %vm654_vm10 = vmor %vm652_vm9, %vm653_vm8  ;;  %v894_v42 = vpop.f32.mrf.mxu3 }
0x11a9   :  { %v649_v14 = vsub.f32 1.0, %v648_v13 }
0x11ab   :  { %v650_v15 = vmul.f32 %v1964_v12, %v649_v14 }
0x11ad   :  { %v651_v16 = vadd.f32 %v1964_v12, %v650_v15 }
0x11af   :  { %v655_v32 = vsel %vm654_vm10, %v1964_v12, %v651_v16 }
0x11b0   :  { %v660_v23 = vsel %vm657_vm11, %v659_v19, %v655_v32 }
0x11b1   :  { %v666_v27 = vmul.f32 %v664_v26, %v660_v23 }
0x120e   :  { %v669_v21 = vpop.permute.xlu1 %668 }
0x120f   :  { %v671_v25 = vmul.f32 %v669_v21, %v660_v23 }
0x1211   :  { %673 = vrot.lane.b32.xlu2 %v671_v25, %s2084_s6 }
0x126b   :  { %v674_v28 = vpop.permute.xlu2 %673 }
0x126c   :  { %v2304_v29 = vadd.f32 %v674_v28, %v666_v27 }
0x126e   :  { %1965 = vtanh.f32 %v2304_v29 }
0x1274   :  { %v1966_v30 = vpop.eup %1965 }
0x1275   :  { %679 = vrot.lane.b32.xlu0 %v1966_v30, %s2083_s4 }
0x12e7   :  { %v680_v35 = vpop.permute.xlu0 %679 }
0x12e8   :  { %v682_v37 = vmul.f32 %v680_v35, %v660_v23 }
0x12ea   :  { %v817_v38 = vsel %vm813_vm6, %v2297_v1, %v682_v37  ;;  %v683_v48 = vpack.c.bf16 %v682_v37, %v682_v37 }
0x12eb   :  { %v819_v39 = vpack.c.bf16 %v817_v38, %v2261_v20  ;;  %v726_v38 = vrot.slane %v2304_v29, 6 }
0x12ec   :  { %v685_v49 = vrot.slane %v683_v48, 3 }
0x12ed   :  { %831 = vrot.lane.b32.xlu1 %v819_v39, %s2084_s6 }
0x135f   :  { %v832_v41 = vpop.permute.xlu1 %831 }
0x1360   :  { %1839 = vmatmul.msk.bf16.vlgmr.msrb.gmra.mxu2 %vm88_vm2, %v832_v41 }
0x13e3   :  { %v862_v44 = vpop.f32.mrf.mxu2 }
0x13e4   :  { %v2348_v45 = vadd.f32 %v2345_v43, %v862_v44 }
0x13e6   :  { %v896_v46 = vadd.f32 %v892_v40, %v2348_v45 }
0x13e8   :  { %1967 = vtanh.f32 %v896_v46  ;;  %v1849_v50 = vmul.f32 -1.442695, %v896_v46 }
0x13ea   :  { %1969 = vpow2.f32 %v1849_v50 }
0x13ee   :  { %v1968_v20 = vpop.eup %1967 }
0x13ef   :  { %919 = vrot.lane.b32.xlu2 %v1968_v20, %s2083_s4 }
0x13f0   :  { %v1970_v51 = vpop.eup %1969 }
0x13f1   :  { %v900_v52 = vadd.f32 1.0, %v1970_v51 }
0x13f3   :  { %1971 = vrcp.f32 %v900_v52  ;;  %v912_v58 = vand.u32 2147483648, %v900_v52  ;;  %vm906_vm13 = vweird.f32 %v900_v52  ;;  %v910_v59 = vand.u32 2147483647, %v900_v52 }
0x13f5   :  { %v913_v61 = vor.u32 1.1754944e-38, %v912_v58  ;;  %vm911_vm1 = vcmp.eq.f32.partialorder %v910_v59, 8.507059e+37 }
0x13f7   :  { %686 = vrot.lane.b32.xlu2 %v685_v49, %s2084_s6 }
0x13f9   :  { %v1972_v53 = vpop.eup %1971 }
0x13fa   :  { %v902_v54 = vmul.f32 %v1972_v53, %v900_v52  ;;  %vm907_vm12 = vweird.f32 %v1972_v53 }
0x13fb   :  { %vm908_vm14 = vmor %vm906_vm13, %vm907_vm12 }
0x13fc   :  { %v903_v55 = vsub.f32 1.0, %v902_v54 }
0x13fe   :  { %v904_v56 = vmul.f32 %v1972_v53, %v903_v55 }
0x1400   :  { %v905_v57 = vadd.f32 %v1972_v53, %v904_v56 }
0x1402   :  { %v909_v60 = vsel %vm908_vm14, %v1972_v53, %v905_v57 }
0x1403   :  { %v914_v63 = vsel %vm911_vm1, %v913_v61, %v909_v60 }
0x1404   :  { %v917_v3 = vmul.f32 0.0, %v914_v63 }
0x1449   :  { %v920_v62 = vpop.permute.xlu2 %919 }
0x144a   :  { %v922_v1 = vmul.f32 %v920_v62, %v914_v63 }
0x144c   :  { %924 = vrot.lane.b32.xlu0 %v922_v1, %s2084_s6 }
0x1451   :  { %v687_v2 = vpop.permute.xlu2 %686 }
0x1452   :  { %1827 = vmatmul.msk.bf16.vlgmr.msra.gmra.mxu0 %vm88_vm2, %v687_v2 }
0x1453   :  { %1142 = vmatpush.bf16.msra.mxu0 %v2314_v33 }
0x1457   :  { %1143 = vmatpush.bf16.msra.mxu0 %v2320_v34 }
0x14be   :  { %v925_v4 = vpop.permute.xlu0 %924 }
0x14bf   :  { %v2357_v24 = vadd.f32 %v925_v4, %v917_v3 }
0x14c1   :  { %1973 = vtanh.f32 %v2357_v24  ;;  %v979_v1 = vrot.slane %v2357_v24, 6 }
0x14c7   :  { %v1974_v5 = vpop.eup %1973 }
0x14c8   :  { %930 = vrot.lane.b32.xlu1 %v1974_v5, %s2083_s4 }
0x14cf   :  { %v700_v7 = vpop.f32.mrf.mxu0 }
0x14d0   :  { %v704_v47 = vadd.f32 %v700_v7, %v2363_v6 }
0x14d2   :  { %1975 = vtanh.f32 %v704_v47  ;;  %v1828_v12 = vmul.f32 -1.442695, %v704_v47 }
0x14d4   :  { %1977 = vpow2.f32 %v1828_v12 }
0x14d7   :  { %v702_v8 = vpop.f32.mrf.mxu0 }
0x14d8   :  { %v1976_v10 = vpop.eup %1975 }
0x14d9   :  { %730 = vrot.lane.b32.xlu1 %v1976_v10, %s2083_s4 }
0x14da   :  { %v1978_v13 = vpop.eup %1977 }
0x14db   :  { %v708_v14 = vadd.f32 1.0, %v1978_v13 }
0x14dd   :  { %1979 = vrcp.f32 %v708_v14  ;;  %v720_v21 = vand.u32 2147483648, %v708_v14  ;;  %vm714_vm4 = vweird.f32 %v708_v14  ;;  %v718_v23 = vand.u32 2147483647, %v708_v14 }
0x14df   :  { %v721_v26 = vor.u32 1.1754944e-38, %v720_v21  ;;  %vm719_vm7 = vcmp.eq.f32.partialorder %v718_v23, 8.507059e+37 }
0x14e3   :  { %v1980_v15 = vpop.eup %1979 }
0x14e4   :  { %v710_v16 = vmul.f32 %v1980_v15, %v708_v14  ;;  %vm715_vm3 = vweird.f32 %v1980_v15 }
0x14e5   :  { %vm716_vm5 = vmor %vm714_vm4, %vm715_vm3 }
0x14e6   :  { %v711_v22 = vsub.f32 1.0, %v710_v16 }
0x14e8   :  { %v712_v32 = vmul.f32 %v1980_v15, %v711_v22 }
0x14ea   :  { %v713_v19 = vadd.f32 %v1980_v15, %v712_v32 }
0x14ec   :  { %v717_v25 = vsel %vm716_vm5, %v1980_v15, %v713_v19 }
0x14ed   :  { %v722_v27 = vsel %vm719_vm7, %v721_v26, %v717_v25 }
0x14ee   :  { %v728_v40 = vmul.f32 %v726_v38, %v722_v27 }
0x153a   :  { %v931_v17 = vpop.permute.xlu1 %930 }
0x153b   :  { %v2367_v18 = vmul.f32 %v931_v17, %v914_v63 }
0x153d   :  { %v934_v36 = vpack.c.bf16 %v2367_v18, %v2367_v18 }
0x153f   :  { %936 = vrot.lane.b32.xlu0 %v934_v36, %s2084_s6 }
0x154b   :  { %v731_v28 = vpop.permute.xlu1 %730 }
0x154c   :  { %v733_v30 = vmul.f32 %v731_v28, %v722_v27 }
0x154e   :  { %735 = vrot.lane.b32.xlu0 %v733_v30, %s2084_s6 }
0x15b1   :  { %v937_v31 = vpop.permute.xlu0 %936 }
0x15b2   :  { %1850 = vmatmul.msk.bf16.vlgmr.msrb.gmra.mxu0 %vm88_vm2, %v937_v31 }
0x15b3   :  { %1398 = vmatpush.bf16.msrb.mxu0 %v2314_v33 }
0x15b7   :  { %1399 = vmatpush.bf16.msrb.mxu0 %v2320_v34 }
0x15c0   :  { %v736_v39 = vpop.permute.xlu0 %735 }
0x15c1   :  { %v2378_v42 = vadd.f32 %v736_v39, %v728_v40 }
0x162f   :  { %v950_v11 = vpop.f32.mrf.mxu0 }
0x1630   :  { %v955_v35 = vrot.slane %v950_v11, 6 }
0x1632   :  { %v957_v37 = vadd.f32 %v955_v35, %v2348_v45 }
0x1634   :  { %1981 = vtanh.f32 %v957_v37  ;;  %v1851_v20 = vmul.f32 -1.442695, %v957_v37 }
0x1635   :  { %1983 = vtanh.f32 %v2378_v42 }
0x1636   :  { %1985 = vpow2.f32 %v1851_v20 }
0x1637   :  { %v952_v41 = vpop.f32.mrf.mxu0 }
0x163a   :  { %v1982_v44 = vpop.eup %1981 }
0x163b   :  { %983 = vrot.lane.b32.xlu2 %v1982_v44, %s2083_s4  ;;  %v1984_v46 = vpop.eup %1983 }
0x163c   :  { %v1986_v48 = vpop.eup %1985 }
0x163d   :  { %v961_v49 = vadd.f32 1.0, %v1986_v48 }
0x163f   :  { %1987 = vrcp.f32 %v961_v49  ;;  %v973_v54 = vand.u32 2147483648, %v961_v49  ;;  %vm967_vm9 = vweird.f32 %v961_v49  ;;  %v971_v55 = vand.u32 2147483647, %v961_v49 }
0x1641   :  { %v974_v57 = vor.u32 1.1754944e-38, %v973_v54  ;;  %vm972_vm11 = vcmp.eq.f32.partialorder %v971_v55, 8.507059e+37 }
0x1643   :  { %741 = vrot.lane.b32.xlu2 %v1984_v46, %s2083_s4 }
0x1645   :  { %v1988_v29 = vpop.eup %1987 }
0x1646   :  { %v963_v50 = vmul.f32 %v1988_v29, %v961_v49  ;;  %vm968_vm8 = vweird.f32 %v1988_v29 }
0x1647   :  { %vm969_vm10 = vmor %vm967_vm9, %vm968_vm8 }
0x1648   :  { %v964_v51 = vsub.f32 1.0, %v963_v50 }
0x164a   :  { %v965_v52 = vmul.f32 %v1988_v29, %v964_v51 }
0x164c   :  { %v966_v53 = vadd.f32 %v1988_v29, %v965_v52 }
0x164e   :  { %v970_v56 = vsel %vm969_vm10, %v1988_v29, %v966_v53 }
0x164f   :  { %v975_v59 = vsel %vm972_vm11, %v974_v57, %v970_v56 }
0x1650   :  { %v981_v2 = vmul.f32 %v979_v1, %v975_v59 }
0x1695   :  { %v984_v58 = vpop.permute.xlu2 %983 }
0x1696   :  { %v986_v60 = vmul.f32 %v984_v58, %v975_v59 }
0x1698   :  { %988 = vrot.lane.b32.xlu1 %v986_v60, %s2084_s6 }
0x169d   :  { %v742_v61 = vpop.permute.xlu2 %741 }
0x169e   :  { %v2384_v62 = vmul.f32 %v742_v61, %v722_v27 }
0x16a0   :  { %v745_v63 = vpack.c.bf16 %v2384_v62, %v2384_v62 }
0x16a2   :  { %747 = vrot.lane.b32.xlu1 %v745_v63, %s2084_s6 }
0x170a   :  { %v989_v3 = vpop.permute.xlu1 %988 }
0x170b   :  { %v991_v4 = vadd.f32 %v989_v3, %v981_v2 }
0x170d   :  { %1989 = vtanh.f32 %v991_v4  ;;  %v1044_v38 = vrot.slane %v991_v4, 6 }
0x1713   :  { %v1990_v5 = vpop.eup %1989 }
0x1714   :  { %994 = vrot.lane.b32.xlu0 %v1990_v5, %s2083_s4  ;;  %v748_v7 = vpop.permute.xlu1 %747 }
0x1715   :  { %1829 = vmatmul.msk.bf16.vlgmr.msra.gmra.mxu1 %vm88_vm2, %v748_v7 }
0x1716   :  { %1203 = vmatpush.bf16.msra.mxu1 %v2314_v33 }
0x171a   :  { %1204 = vmatpush.bf16.msra.mxu1 %v2320_v34 }
0x1786   :  { %v995_v47 = vpop.permute.xlu0 %994 }
0x1787   :  { %v997_v8 = vmul.f32 %v995_v47, %v975_v59 }
0x1789   :  { %v998_v10 = vpack.c.bf16 %v997_v8, %v997_v8  ;;  %v1510_v48 = vsel %vm809_vm15, %v2367_v18, %v997_v8 }
0x178b   :  { %v1000_v12 = vrot.slane %v998_v10, 1 }
0x178d   :  { %1001 = vrot.lane.b32.xlu2 %v1000_v12, %s2084_s6 }
0x1792   :  { %v2395_v24 = vpop.f32.mrf.mxu1 }
0x179a   :  { %v763_v13 = vpop.f32.mrf.mxu1 }
0x17e7   :  { %v1002_v14 = vpop.permute.xlu2 %1001 }
0x17e8   :  { %1852 = vmatmul.msk.bf16.vlgmr.msrb.gmra.mxu1 %vm88_vm2, %v1002_v14 }
0x17e9   :  { %1459 = vmatpush.bf16.msrb.mxu1 %v2314_v33 }
0x17ed   :  { %1460 = vmatpush.bf16.msrb.mxu1 %v2320_v34 }
0x1865   :  { %v1015_v15 = vpop.f32.mrf.mxu1 }
0x1866   :  { %v1020_v16 = vrot.slane %v1015_v15, 4 }
0x1868   :  { %v1022_v17 = vadd.f32 %v1020_v16, %v2348_v45 }
0x186a   :  { %1991 = vtanh.f32 %v1022_v17  ;;  %v1853_v32 = vmul.f32 -1.442695, %v1022_v17 }
0x186c   :  { %1993 = vpow2.f32 %v1853_v32 }
0x186d   :  { %v1017_v22 = vpop.f32.mrf.mxu1 }
0x1870   :  { %v1992_v36 = vpop.eup %1991 }
0x1871   :  { %1048 = vrot.lane.b32.xlu0 %v1992_v36, %s2083_s4 }
0x1872   :  { %v1994_v19 = vpop.eup %1993 }
0x1873   :  { %v1026_v21 = vadd.f32 1.0, %v1994_v19  ;;  %v864_v19 = vpop.f32.mrf.mxu2 }
0x1875   :  { %1995 = vrcp.f32 %v1026_v21  ;;  %v1038_v34 = vand.u32 2147483648, %v1026_v21  ;;  %vm1032_vm13 = vweird.f32 %v1026_v21  ;;  %v1036_v28 = vand.u32 2147483647, %v1026_v21 }
0x1877   :  { %v1039_v31 = vor.u32 1.1754944e-38, %v1038_v34  ;;  %vm1037_vm1 = vcmp.eq.f32.partialorder %v1036_v28, 8.507059e+37 }
0x187b   :  { %v1996_v23 = vpop.eup %1995 }
0x187c   :  { %v1028_v25 = vmul.f32 %v1996_v23, %v1026_v21  ;;  %vm1033_vm12 = vweird.f32 %v1996_v23  ;;  %v2419_v21 = vadd.f32 %v2345_v43, %v864_v19 }
0x187d   :  { %vm1034_vm14 = vmor %vm1032_vm13, %vm1033_vm12 }
0x187e   :  { %v1029_v26 = vsub.f32 1.0, %v1028_v25 }
0x1880   :  { %v1030_v33 = vmul.f32 %v1996_v23, %v1029_v26 }
0x1882   :  { %v1031_v27 = vadd.f32 %v1996_v23, %v1030_v33 }
0x1884   :  { %v1035_v30 = vsel %vm1034_vm14, %v1996_v23, %v1031_v27 }
0x1885   :  { %v1040_v35 = vsel %vm1037_vm1, %v1039_v31, %v1035_v30 }
0x1886   :  { %v1046_v39 = vmul.f32 %v1044_v38, %v1040_v35 }
0x18e3   :  { %v1049_v11 = vpop.permute.xlu0 %1048 }
0x18e4   :  { %v1051_v37 = vmul.f32 %v1049_v11, %v1040_v35 }
0x18e6   :  { %1053 = vrot.lane.b32.xlu1 %v1051_v37, %s2084_s6 }
0x1958   :  { %v1054_v40 = vpop.permute.xlu1 %1053 }
0x1959   :  { %v1056_v41 = vadd.f32 %v1054_v40, %v1046_v39  ;;  %v766_v40 = vrot.slane %v2395_v24, 6 }
0x195b   :  { %1997 = vtanh.f32 %v1056_v41  ;;  %v1109_v8 = vrot.slane %v1056_v41, 6 }
0x1961   :  { %v1998_v44 = vpop.eup %1997 }
0x1962   :  { %1059 = vrot.lane.b32.xlu2 %v1998_v44, %s2083_s4 }
0x19bc   :  { %v1060_v46 = vpop.permute.xlu2 %1059 }
0x19bd   :  { %v1062_v20 = vmul.f32 %v1060_v46, %v1040_v35  ;;  %v768_v46 = vadd.f32 %v766_v40, %v2363_v6 }
0x19bf   :  { %v1063_v49 = vpack.c.bf16 %v1062_v20, %v1062_v20  ;;  %v1511_v29 = vsel %vm811_vm0, %v1510_v48, %v1062_v20  ;;  %v1830_v6 = vmul.f32 -1.442695, %v768_v46 }
0x19c1   :  { %v1065_v50 = vrot.slane %v1063_v49, 2 }
0x19c3   :  { %1066 = vrot.lane.b32.xlu0 %v1065_v50, %s2084_s6 }
0x1a35   :  { %v1067_v51 = vpop.permute.xlu0 %1066 }
0x1a36   :  { %1854 = vmatmul.msk.bf16.vlgmr.msra.gmra.mxu3 %vm88_vm2, %v1067_v51 }
0x1ab9   :  { %v1080_v52 = vpop.f32.mrf.mxu3 }
0x1aba   :  { %v1085_v53 = vrot.slane %v1080_v52, 2 }
0x1abc   :  { %v1087_v54 = vadd.f32 %v1085_v53, %v2348_v45 }
0x1abe   :  { %1999 = vtanh.f32 %v1087_v54  ;;  %v1855_v57 = vmul.f32 -1.442695, %v1087_v54 }
0x1ac0   :  { %2001 = vpow2.f32 %v1855_v57 }
0x1ac1   :  { %v1082_v55 = vpop.f32.mrf.mxu3 }
0x1ac4   :  { %v2000_v56 = vpop.eup %1999 }
0x1ac5   :  { %1113 = vrot.lane.b32.xlu1 %v2000_v56, %s2083_s4 }
0x1ac6   :  { %v2002_v18 = vpop.eup %2001 }
0x1ac7   :  { %v1091_v58 = vadd.f32 1.0, %v2002_v18 }
0x1ac9   :  { %2003 = vrcp.f32 %v1091_v58  ;;  %v1103_v2 = vand.u32 2147483648, %v1091_v58  ;;  %vm1097_vm4 = vweird.f32 %v1091_v58  ;;  %v1101_v3 = vand.u32 2147483647, %v1091_v58 }
0x1acb   :  { %v1104_v4 = vor.u32 1.1754944e-38, %v1103_v2  ;;  %vm1102_vm7 = vcmp.eq.f32.partialorder %v1101_v3, 8.507059e+37 }
0x1acf   :  { %v2004_v59 = vpop.eup %2003 }
0x1ad0   :  { %v1093_v60 = vmul.f32 %v2004_v59, %v1091_v58  ;;  %vm1098_vm3 = vweird.f32 %v2004_v59 }
0x1ad1   :  { %vm1099_vm5 = vmor %vm1097_vm4, %vm1098_vm3 }
0x1ad2   :  { %v1094_v61 = vsub.f32 1.0, %v1093_v60 }
0x1ad4   :  { %v1095_v63 = vmul.f32 %v2004_v59, %v1094_v61 }
0x1ad6   :  { %v1096_v1 = vadd.f32 %v2004_v59, %v1095_v63 }
0x1ad8   :  { %v1100_v45 = vsel %vm1099_vm5, %v2004_v59, %v1096_v1 }
0x1ad9   :  { %v1105_v7 = vsel %vm1102_vm7, %v1104_v4, %v1100_v45 }
0x1ada   :  { %v1111_v10 = vmul.f32 %v1109_v8, %v1105_v7 }
0x1b37   :  { %v1114_v5 = vpop.permute.xlu1 %1113 }
0x1b38   :  { %v1116_v47 = vmul.f32 %v1114_v5, %v1105_v7 }
0x1b3a   :  { %1118 = vrot.lane.b32.xlu2 %v1116_v47, %s2084_s6 }
0x1b94   :  { %v1119_v12 = vpop.permute.xlu2 %1118 }
0x1b95   :  { %v1121_v13 = vadd.f32 %v1119_v12, %v1111_v10 }
0x1b97   :  { %2005 = vtanh.f32 %v1121_v13  ;;  %v1171_v50 = vrot.slane %v1121_v13, 6  ;;  %v790_v13 = vrot.slane %v2378_v42, 6 }
0x1b9d   :  { %v2006_v14 = vpop.eup %2005 }
0x1b9e   :  { %1124 = vrot.lane.b32.xlu0 %v2006_v14, %s2083_s4 }
0x1c10   :  { %v1125_v15 = vpop.permute.xlu0 %1124 }
0x1c11   :  { %v1127_v16 = vmul.f32 %v1125_v15, %v1105_v7 }
0x1c13   :  { %v1128_v17 = vpack.c.bf16 %v1127_v16, %v1127_v16  ;;  %v2414_v22 = vsel %vm813_vm6, %v1511_v29, %v1127_v16 }
0x1c15   :  { %v1130_v36 = vrot.slane %v1128_v17, 3 }
0x1c17   :  { %1131 = vrot.lane.b32.xlu1 %v1130_v36, %s2084_s6 }
0x1c89   :  { %v1132_v32 = vpop.permute.xlu1 %1131 }
0x1c8a   :  { %1856 = vmatmul.msk.bf16.vlgmr.msra.gmra.mxu0 %vm88_vm2, %v1132_v32 }
0x1d07   :  { %v1145_v23 = vpop.f32.mrf.mxu0 }
0x1d08   :  { %v1149_v25 = vadd.f32 %v1145_v23, %v2419_v21 }
0x1d0a   :  { %2007 = vtanh.f32 %v1149_v25  ;;  %v1857_v27 = vmul.f32 -1.442695, %v1149_v25 }
0x1d0c   :  { %2009 = vpow2.f32 %v1857_v27 }
0x1d0f   :  { %v1147_v26 = vpop.f32.mrf.mxu0 }
0x1d10   :  { %v2008_v33 = vpop.eup %2007 }
0x1d11   :  { %1175 = vrot.lane.b32.xlu2 %v2008_v33, %s2083_s4 }
0x1d12   :  { %v2010_v34 = vpop.eup %2009 }
0x1d13   :  { %v1153_v28 = vadd.f32 1.0, %v2010_v34 }
0x1d15   :  { %2011 = vrcp.f32 %v1153_v28  ;;  %v1165_v38 = vand.u32 2147483648, %v1153_v28  ;;  %vm1159_vm9 = vweird.f32 %v1153_v28  ;;  %v1163_v39 = vand.u32 2147483647, %v1153_v28 }
0x1d16   :  { %2013 = vtanh.f32 %v768_v46 }
0x1d17   :  { %v1166_v44 = vor.u32 1.1754944e-38, %v1165_v38  ;;  %vm1164_vm11 = vcmp.eq.f32.partialorder %v1163_v39, 8.507059e+37 }
0x1d1b   :  { %v2012_v30 = vpop.eup %2011 }
0x1d1c   :  { %v1155_v31 = vmul.f32 %v2012_v30, %v1153_v28  ;;  %vm1160_vm8 = vweird.f32 %v2012_v30  ;;  %v2014_v29 = vpop.eup %2013 }
0x1d1d   :  { %vm1161_vm10 = vmor %vm1159_vm9, %vm1160_vm8 }
0x1d1e   :  { %v1156_v11 = vsub.f32 1.0, %v1155_v31 }
0x1d20   :  { %v1157_v35 = vmul.f32 %v2012_v30, %v1156_v11 }
0x1d22   :  { %v1158_v37 = vadd.f32 %v2012_v30, %v1157_v35 }
0x1d24   :  { %v1162_v41 = vsel %vm1161_vm10, %v2012_v30, %v1158_v37 }
0x1d25   :  { %v1167_v48 = vsel %vm1164_vm11, %v1166_v44, %v1162_v41 }
0x1d26   :  { %v1173_v51 = vmul.f32 %v1171_v50, %v1167_v48 }
0x1d6b   :  { %v1176_v20 = vpop.permute.xlu2 %1175 }
0x1d6c   :  { %v1178_v49 = vmul.f32 %v1176_v20, %v1167_v48 }
0x1d6e   :  { %1180 = vrot.lane.b32.xlu0 %v1178_v49, %s2084_s6 }
0x1d76   :  { %794 = vrot.lane.b32.xlu0 %v2014_v29, %s2083_s4 }
0x1de0   :  { %v1181_v52 = vpop.permute.xlu0 %1180 }
0x1de1   :  { %v2427_v53 = vadd.f32 %v1181_v52, %v1173_v51 }
0x1de3   :  { %2015 = vtanh.f32 %v2427_v53  ;;  %v1235_v46 = vrot.slane %v2427_v53, 6 }
0x1de4   :  { %2017 = vpow2.f32 %v1830_v6 }
0x1de8   :  { %v795_v4 = vpop.permute.xlu0 %794 }
0x1de9   :  { %v2016_v24 = vpop.eup %2015 }
0x1dea   :  { %1186 = vrot.lane.b32.xlu1 %v2016_v24, %s2083_s4  ;;  %v2018_v54 = vpop.eup %2017 }
0x1deb   :  { %v772_v55 = vadd.f32 1.0, %v2018_v54 }
0x1ded   :  { %2019 = vrcp.f32 %v772_v55  ;;  %v784_v1 = vand.u32 2147483648, %v772_v55  ;;  %vm778_vm13 = vweird.f32 %v772_v55  ;;  %v782_v2 = vand.u32 2147483647, %v772_v55 }
0x1def   :  { %v785_v45 = vor.u32 1.1754944e-38, %v784_v1  ;;  %vm783_vm1 = vcmp.eq.f32.partialorder %v782_v2, 8.507059e+37 }
0x1df3   :  { %v2020_v56 = vpop.eup %2019 }
0x1df4   :  { %v774_v57 = vmul.f32 %v2020_v56, %v772_v55  ;;  %vm779_vm12 = vweird.f32 %v2020_v56 }
0x1df5   :  { %vm780_vm14 = vmor %vm778_vm13, %vm779_vm12 }
0x1df6   :  { %v775_v18 = vsub.f32 1.0, %v774_v57 }
0x1df8   :  { %v776_v58 = vmul.f32 %v2020_v56, %v775_v18 }
0x1dfa   :  { %v777_v61 = vadd.f32 %v2020_v56, %v776_v58 }
0x1dfc   :  { %v781_v3 = vsel %vm780_vm14, %v2020_v56, %v777_v61 }
0x1dfd   :  { %v786_v5 = vsel %vm783_vm1, %v785_v45, %v781_v3 }
0x1dfe   :  { %v797_v7 = vmul.f32 %v795_v4, %v786_v5  ;;  %v792_v15 = vmul.f32 %v790_v13, %v786_v5 }
0x1e5c   :  { %v1187_v59 = vpop.permute.xlu1 %1186 }
0x1e5d   :  { %v2431_v60 = vmul.f32 %v1187_v59, %v1167_v48 }
0x1e5f   :  { %v1190_v63 = vpack.c.bf16 %v2431_v60, %v2431_v60 }
0x1e61   :  { %1192 = vrot.lane.b32.xlu2 %v1190_v63, %s2084_s6 }
0x1e69   :  { %799 = vrot.lane.b32.xlu2 %v797_v7, %s2084_s6 }
0x1ebb   :  { %v1193_v47 = vpop.permute.xlu2 %1192 }
0x1ebc   :  { %1858 = vmatmul.msk.bf16.vlgmr.msra.gmra.mxu1 %vm88_vm2, %v1193_v47 }
0x1ec3   :  { %v800_v14 = vpop.permute.xlu2 %799 }
0x1ec4   :  { %v802_v17 = vadd.f32 %v800_v14, %v792_v15 }
0x1f39   :  { %v1206_v8 = vpop.f32.mrf.mxu1 }
0x1f3a   :  { %v1211_v10 = vrot.slane %v1206_v8, 6 }
0x1f3c   :  { %v1213_v12 = vadd.f32 %v1211_v10, %v2419_v21 }
0x1f3e   :  { %2021 = vtanh.f32 %v1213_v12  ;;  %v1859_v19 = vmul.f32 -1.442695, %v1213_v12 }
0x1f3f   :  { %2023 = vtanh.f32 %v802_v17 }
0x1f40   :  { %2025 = vpow2.f32 %v1859_v19 }
0x1f41   :  { %v1208_v16 = vpop.f32.mrf.mxu1 }
0x1f44   :  { %v2022_v36 = vpop.eup %2021 }
0x1f45   :  { %1239 = vrot.lane.b32.xlu1 %v2022_v36, %s2083_s4  ;;  %v2024_v32 = vpop.eup %2023 }
0x1f46   :  { %v2026_v23 = vpop.eup %2025 }
0x1f47   :  { %v1217_v25 = vadd.f32 1.0, %v2026_v23 }
0x1f49   :  { %2027 = vrcp.f32 %v1217_v25  ;;  %v1229_v28 = vand.u32 2147483648, %v1217_v25  ;;  %vm1223_vm4 = vweird.f32 %v1217_v25  ;;  %v1227_v30 = vand.u32 2147483647, %v1217_v25 }
0x1f4b   :  { %v1230_v11 = vor.u32 1.1754944e-38, %v1229_v28  ;;  %vm1228_vm7 = vcmp.eq.f32.partialorder %v1227_v30, 8.507059e+37 }
0x1f4d   :  { %805 = vrot.lane.b32.xlu1 %v2024_v32, %s2083_s4 }
0x1f4f   :  { %v2028_v26 = vpop.eup %2027 }
0x1f50   :  { %v1219_v33 = vmul.f32 %v2028_v26, %v1217_v25  ;;  %vm1224_vm3 = vweird.f32 %v2028_v26 }
0x1f51   :  { %vm1225_vm5 = vmor %vm1223_vm4, %vm1224_vm3 }
0x1f52   :  { %v1220_v42 = vsub.f32 1.0, %v1219_v33 }
0x1f54   :  { %v1221_v27 = vmul.f32 %v2028_v26, %v1220_v42 }
0x1f56   :  { %v1222_v34 = vadd.f32 %v2028_v26, %v1221_v27 }
0x1f58   :  { %v1226_v31 = vsel %vm1225_vm5, %v2028_v26, %v1222_v34 }
0x1f59   :  { %v1231_v37 = vsel %vm1228_vm7, %v1230_v11, %v1226_v31 }
0x1f5a   :  { %v1237_v20 = vmul.f32 %v1235_v46, %v1231_v37 }
0x1fb7   :  { %v1240_v35 = vpop.permute.xlu1 %1239 }
0x1fb8   :  { %v1242_v38 = vmul.f32 %v1240_v35, %v1231_v37 }
0x1fba   :  { %1244 = vrot.lane.b32.xlu0 %v1242_v38, %s2084_s6 }
0x1fbf   :  { %v806_v39 = vpop.permute.xlu1 %805 }
0x1fc0   :  { %v808_v40 = vmul.f32 %v806_v39, %v786_v5 }
0x1fc2   :  { %v818_v41 = vsel %vm809_vm15, %v2384_v62, %v808_v40 }
0x1fc3   :  { %v820_v44 = vpack.c.bf16 %v818_v41, %v818_v41 }
0x1fc5   :  { %833 = vrot.lane.b32.xlu0 %v820_v44, %s2084_s6 }
0x202c   :  { %v1245_v48 = vpop.permute.xlu0 %1244 }
0x202d   :  { %v1247_v49 = vadd.f32 %v1245_v48, %v1237_v20 }
0x202f   :  { %2029 = vtanh.f32 %v1247_v49  ;;  %v1300_v14 = vrot.slane %v1247_v49, 6 }
0x2035   :  { %v2030_v29 = vpop.eup %2029 }
0x2036   :  { %1250 = vrot.lane.b32.xlu2 %v2030_v29, %s2083_s4 }
0x2037   :  { %v834_v50 = vpop.permute.xlu0 %833 }
0x2038   :  { %1840 = vmatmul.msk.bf16.gmra.mxu2 %vm88_vm2, %v834_v50 }
0x2090   :  { %v1251_v51 = vpop.permute.xlu2 %1250 }
0x2091   :  { %v1253_v52 = vmul.f32 %v1251_v51, %v1231_v37 }
0x2093   :  { %v1254_v24 = vpack.c.bf16 %v1253_v52, %v1253_v52  ;;  %v1513_v23 = vsel %vm809_vm15, %v2431_v60, %v1253_v52 }
0x2095   :  { %v1256_v6 = vrot.slane %v1254_v24, 1 }
0x2097   :  { %1257 = vrot.lane.b32.xlu1 %v1256_v6, %s2084_s6 }
0x20bb   :  { %v2450_v62 = vpop.f32.mrf.mxu2 }
0x20c3   :  { %v869_v54 = vpop.f32.mrf.mxu2 }
0x2109   :  { %v1258_v53 = vpop.permute.xlu1 %1257 }
0x210a   :  { %1860 = vmatmul.msk.bf16.vlgmr.msra.gmra.mxu2 %vm88_vm2, %v1258_v53 }
0x218d   :  { %v1271_v55 = vpop.f32.mrf.mxu2 }
0x218e   :  { %v1276_v56 = vrot.slane %v1271_v55, 4 }
0x2190   :  { %v1278_v57 = vadd.f32 %v1276_v56, %v2419_v21 }
0x2192   :  { %2031 = vtanh.f32 %v1278_v57  ;;  %v1861_v59 = vmul.f32 -1.442695, %v1278_v57 }
0x2194   :  { %2033 = vpow2.f32 %v1861_v59  ;;  %v868_v59 = vadd.f32 %v2345_v43, %v2450_v62 }
0x2195   :  { %v1273_v18 = vpop.f32.mrf.mxu2 }
0x2198   :  { %v2032_v58 = vpop.eup %2031 }
0x2199   :  { %1304 = vrot.lane.b32.xlu2 %v2032_v58, %s2083_s4 }
0x219a   :  { %v2034_v61 = vpop.eup %2033 }
0x219b   :  { %v1282_v63 = vadd.f32 1.0, %v2034_v61 }
0x219d   :  { %2035 = vrcp.f32 %v1282_v63  ;;  %v1294_v5 = vand.u32 2147483648, %v1282_v63  ;;  %vm1288_vm9 = vweird.f32 %v1282_v63  ;;  %v1292_v7 = vand.u32 2147483647, %v1282_v63 }
0x219f   :  { %v1295_v8 = vor.u32 1.1754944e-38, %v1294_v5  ;;  %vm1293_vm11 = vcmp.eq.f32.partialorder %v1292_v7, 8.507059e+37 }
0x21a3   :  { %v2036_v1 = vpop.eup %2035 }
0x21a4   :  { %v1284_v2 = vmul.f32 %v2036_v1, %v1282_v63  ;;  %vm1289_vm8 = vweird.f32 %v2036_v1 }
0x21a5   :  { %vm1290_vm10 = vmor %vm1288_vm9, %vm1289_vm8 }
0x21a6   :  { %v1285_v3 = vsub.f32 1.0, %v1284_v2 }
0x21a8   :  { %v1286_v45 = vmul.f32 %v2036_v1, %v1285_v3 }
0x21aa   :  { %v1287_v4 = vadd.f32 %v2036_v1, %v1286_v45 }
0x21ac   :  { %v1291_v47 = vsel %vm1290_vm10, %v2036_v1, %v1287_v4 }
0x21ad   :  { %v1296_v12 = vsel %vm1293_vm11, %v1295_v8, %v1291_v47 }
0x21ae   :  { %v1302_v15 = vmul.f32 %v1300_v14, %v1296_v12 }
0x21f3   :  { %v1305_v10 = vpop.permute.xlu2 %1304 }
0x21f4   :  { %v1307_v13 = vmul.f32 %v1305_v10, %v1296_v12 }
0x21f6   :  { %1309 = vrot.lane.b32.xlu0 %v1307_v13, %s2084_s6 }
0x2268   :  { %v1310_v16 = vpop.permute.xlu0 %1309 }
0x2269   :  { %v1312_v17 = vadd.f32 %v1310_v16, %v1302_v15 }
0x226b   :  { %2037 = vtanh.f32 %v1312_v17  ;;  %v1365_v50 = vrot.slane %v1312_v17, 6 }
0x2271   :  { %v2038_v36 = vpop.eup %2037 }
0x2272   :  { %1315 = vrot.lane.b32.xlu1 %v2038_v36, %s2083_s4 }
0x22e4   :  { %v1316_v32 = vpop.permute.xlu1 %1315 }
0x22e5   :  { %v1318_v19 = vmul.f32 %v1316_v32, %v1296_v12 }
0x22e7   :  { %v1319_v25 = vpack.c.bf16 %v1318_v19, %v1318_v19  ;;  %v1514_v26 = vsel %vm811_vm0, %v1513_v23, %v1318_v19 }
0x22e9   :  { %v1321_v33 = vrot.slane %v1319_v25, 2 }
0x22eb   :  { %1322 = vrot.lane.b32.xlu2 %v1321_v33, %s2084_s6 }
0x2345   :  { %v1323_v42 = vpop.permute.xlu2 %1322 }
0x2346   :  { %1862 = vmatmul.msk.bf16.vlgmr.msrb.gmra.mxu3 %vm88_vm2, %v1323_v42 }
0x23c9   :  { %v1336_v27 = vpop.f32.mrf.mxu3 }
0x23ca   :  { %v1341_v34 = vrot.slane %v1336_v27, 2 }
0x23cc   :  { %v1343_v28 = vadd.f32 %v1341_v34, %v2419_v21 }
0x23ce   :  { %2039 = vtanh.f32 %v1343_v28  ;;  %v1863_v11 = vmul.f32 -1.442695, %v1343_v28 }
0x23d0   :  { %2041 = vpow2.f32 %v1863_v11 }
0x23d1   :  { %v1338_v30 = vpop.f32.mrf.mxu3 }
0x23d4   :  { %v2040_v31 = vpop.eup %2039 }
0x23d5   :  { %1369 = vrot.lane.b32.xlu0 %v2040_v31, %s2083_s4 }
0x23d6   :  { %v2042_v60 = vpop.eup %2041 }
0x23d7   :  { %v1347_v35 = vadd.f32 1.0, %v2042_v60 }
0x23d9   :  { %2043 = vrcp.f32 %v1347_v35  ;;  %v1359_v44 = vand.u32 2147483648, %v1347_v35  ;;  %vm1353_vm12 = vweird.f32 %v1347_v35  ;;  %v1357_v46 = vand.u32 2147483647, %v1347_v35 }
0x23db   :  { %v1360_v20 = vor.u32 1.1754944e-38, %v1359_v44  ;;  %vm1358_vm14 = vcmp.eq.f32.partialorder %v1357_v46, 8.507059e+37 }
0x23df   :  { %v2044_v37 = vpop.eup %2043 }
0x23e0   :  { %v1349_v38 = vmul.f32 %v2044_v37, %v1347_v35  ;;  %vm1354_vm0 = vweird.f32 %v2044_v37  ;;  %v1892_v35 = vld [vmem:[%s2602_s10 + $0x8] sm:$0xff] }
0x23e1   :  { %vm1355_vm13 = vmor %vm1353_vm12, %vm1354_vm0  ;;  %1553 = vmatpush.bf16.msrb.mxu2 %v1892_v35  ;;  %vm1629_vm12 = vcmask 7168  }
0x23e2   :  { %v1350_v39 = vsub.f32 1.0, %v1349_v38 }
0x23e4   :  { %v1351_v40 = vmul.f32 %v2044_v37, %v1350_v39 }
0x23e6   :  { %v1352_v41 = vadd.f32 %v2044_v37, %v1351_v40 }
0x23e8   :  { %v1356_v21 = vsel %vm1355_vm13, %v2044_v37, %v1352_v41  ;;  %v1891_v37 = vld [vmem:[%s2602_s10] sm:$0xff] }
0x23e9   :  { %v1361_v49 = vsel %vm1358_vm14, %v1360_v20, %v1356_v21  ;;  %1554 = vmatpush.bf16.msrb.mxu2 %v1891_v37 }
0x23ea   :  { %v1367_v51 = vmul.f32 %v1365_v50, %v1361_v49 }
0x2447   :  { %v1370_v48 = vpop.permute.xlu0 %1369 }
0x2448   :  { %v1372_v29 = vmul.f32 %v1370_v48, %v1361_v49 }
0x244a   :  { %1374 = vrot.lane.b32.xlu1 %v1372_v29, %s2084_s6 }
0x24bc   :  { %v1375_v52 = vpop.permute.xlu1 %1374 }
0x24bd   :  { %v1377_v24 = vadd.f32 %v1375_v52, %v1367_v51 }
0x24bf   :  { %2045 = vtanh.f32 %v1377_v24  ;;  %v1427_v16 = vrot.slane %v1377_v24, 6 }
0x24c5   :  { %v2046_v6 = vpop.eup %2045 }
0x24c6   :  { %1380 = vrot.lane.b32.xlu2 %v2046_v6, %s2083_s4 }
0x2520   :  { %v1381_v54 = vpop.permute.xlu2 %1380 }
0x2521   :  { %v1383_v53 = vmul.f32 %v1381_v54, %v1361_v49 }
0x2523   :  { %v1384_v55 = vpack.c.bf16 %v1383_v53, %v1383_v53  ;;  %v1515_v56 = vsel %vm813_vm6, %v1514_v26, %v1383_v53 }
0x2524   :  { %v1517_v57 = vpack.c.bf16 %v1515_v56, %v2414_v22 }
0x2525   :  { %v1386_v18 = vrot.slane %v1384_v55, 3 }
0x2527   :  { %1387 = vrot.lane.b32.xlu0 %v1386_v18, %s2084_s6 }
0x2599   :  { %v1388_v58 = vpop.permute.xlu0 %1387 }
0x259a   :  { %1864 = vmatmul.msk.bf16.vlgmr.msrb.gmra.mxu0 %vm88_vm2, %v1388_v58 }
0x2617   :  { %v1401_v61 = vpop.f32.mrf.mxu0 }
0x2618   :  { %v1405_v63 = vadd.f32 %v1401_v61, %v868_v59 }
0x261a   :  { %2047 = vtanh.f32 %v1405_v63  ;;  %v1865_v3 = vmul.f32 -1.442695, %v1405_v63 }
0x261c   :  { %2049 = vpow2.f32 %v1865_v3 }
0x261f   :  { %v1403_v1 = vpop.f32.mrf.mxu0 }
0x2620   :  { %v2048_v2 = vpop.eup %2047 }
0x2621   :  { %1431 = vrot.lane.b32.xlu1 %v2048_v2, %s2083_s4 }
0x2622   :  { %v2050_v45 = vpop.eup %2049 }
0x2623   :  { %v1409_v22 = vadd.f32 1.0, %v2050_v45 }
0x2625   :  { %2051 = vrcp.f32 %v1409_v22  ;;  %v1421_v10 = vand.u32 2147483648, %v1409_v22  ;;  %vm1415_vm1 = vweird.f32 %v1409_v22  ;;  %v1419_v43 = vand.u32 2147483647, %v1409_v22 }
0x2627   :  { %v1422_v12 = vor.u32 1.1754944e-38, %v1421_v10  ;;  %vm1420_vm4 = vcmp.eq.f32.partialorder %v1419_v43, 8.507059e+37  ;;  %v1668_v43 = vld [vmem:[%s2604_s12 + $0x18] sm:$0xff] }
0x2628   :  { %1690 = vmatpush.msra.mxu3 %v1668_v43 }
0x262b   :  { %v2052_v4 = vpop.eup %2051 }
0x262c   :  { %v1411_v5 = vmul.f32 %v2052_v4, %v1409_v22  ;;  %vm1416_vm6 = vweird.f32 %v2052_v4 }
0x262d   :  { %vm1417_vm3 = vmor %vm1415_vm1, %vm1416_vm6 }
0x262e   :  { %v1412_v7 = vsub.f32 1.0, %v1411_v5 }
0x2630   :  { %v1413_v47 = vmul.f32 %v2052_v4, %v1412_v7 }
0x2632   :  { %v1414_v8 = vadd.f32 %v2052_v4, %v1413_v47 }
0x2634   :  { %v1418_v62 = vsel %vm1417_vm3, %v2052_v4, %v1414_v8  ;;  %vm1632_vm3 = vcmask 3072  }
0x2635   :  { %v1423_v14 = vsel %vm1420_vm4, %v1422_v12, %v1418_v62  ;;  %v1667_v62 = vld [vmem:[%s2604_s12 + $0x10] sm:$0xff]  ;;  %v1666_v12 = vld [vmem:[%s2604_s12 + $0x8] sm:$0xff] }
0x2636   :  { %v1429_v17 = vmul.f32 %v1427_v16, %v1423_v14  ;;  %1691 = vmatpush.msra.mxu3 %v1667_v62 }
0x2638   :  { %1692 = vmatpush.msra.mxu3 %v1666_v12 }
0x2693   :  { %v1432_v13 = vpop.permute.xlu1 %1431 }
0x2694   :  { %v1434_v15 = vmul.f32 %v1432_v13, %v1423_v14  ;;  %v1665_v13 = vld [vmem:[%s2604_s12] sm:$0xff] }
0x2695   :  { %1693 = vmatpush.msra.mxu3 %v1665_v13 }
0x2696   :  { %1436 = vrot.lane.b32.xlu2 %v1434_v15, %s2084_s6  ;;  %v1902_v15 = vld [vmem:[%s2603_s11] ss:$0 sm:$0xff] }
0x26f0   :  { %v1437_v36 = vpop.permute.xlu2 %1436 }
0x26f1   :  { %v1439_v32 = vadd.f32 %v1437_v36, %v1429_v17 }
0x26f3   :  { %2053 = vtanh.f32 %v1439_v32  ;;  %v1491_v52 = vrot.slane %v1439_v32, 6 }
0x26f9   :  { %v2054_v19 = vpop.eup %2053 }
0x26fa   :  { %1442 = vrot.lane.b32.xlu0 %v2054_v19, %s2083_s4 }
0x276c   :  { %v1443_v23 = vpop.permute.xlu0 %1442 }
0x276d   :  { %v1445_v25 = vmul.f32 %v1443_v23, %v1423_v14 }
0x276f   :  { %v1446_v26 = vpack.c.bf16 %v1445_v25, %v1445_v25 }
0x2771   :  { %1448 = vrot.lane.b32.xlu1 %v1446_v26, %s2084_s6 }
0x27e3   :  { %v1449_v33 = vpop.permute.xlu1 %1448 }
0x27e4   :  { %1866 = vmatmul.msk.bf16.vlgmr.msrb.gmra.mxu1 %vm88_vm2, %v1449_v33 }
0x2861   :  { %v1462_v42 = vpop.f32.mrf.mxu1 }
0x2862   :  { %v1467_v27 = vrot.slane %v1462_v42, 6 }
0x2864   :  { %v1469_v34 = vadd.f32 %v1467_v27, %v868_v59 }
0x2866   :  { %2055 = vtanh.f32 %v1469_v34  ;;  %v1867_v31 = vmul.f32 -1.442695, %v1469_v34 }
0x2868   :  { %2057 = vpow2.f32 %v1867_v31 }
0x2869   :  { %v1464_v28 = vpop.f32.mrf.mxu1 }
0x286a   :  { %v1599_v28 = vld [vmem:[%s2605_s1] sm:$0xff] }
0x286c   :  { %v2056_v30 = vpop.eup %2055 }
0x286d   :  { %1495 = vrot.lane.b32.xlu2 %v2056_v30, %s2083_s4  ;;  %v1601_v30 = vld [vmem:[%s2605_s1 + $0x10] sm:$0xf] }
0x286e   :  { %v2058_v11 = vpop.eup %2057 }
0x286f   :  { %v1473_v60 = vadd.f32 1.0, %v2058_v11 }
0x2871   :  { %2059 = vrcp.f32 %v1473_v60  ;;  %v1485_v46 = vand.u32 2147483648, %v1473_v60  ;;  %vm1479_vm7 = vweird.f32 %v1473_v60  ;;  %v1483_v21 = vand.u32 2147483647, %v1473_v60 }
0x2873   :  { %v1486_v48 = vor.u32 1.1754944e-38, %v1485_v46  ;;  %vm1484_vm9 = vcmp.eq.f32.partialorder %v1483_v21, 8.507059e+37 }
0x2875   :  { %1525 = vrot.lane.b32.xlu2 %v1517_v57, %s2084_s6 }
0x2877   :  { %v2060_v38 = vpop.eup %2059 }
0x2878   :  { %v1475_v39 = vmul.f32 %v2060_v38, %v1473_v60  ;;  %vm1480_vm5 = vweird.f32 %v2060_v38  ;;  %v1656_v60 = vld [vmem:[%s2606_s2] sm:$0xff] }
0x2879   :  { %vm1481_vm8 = vmor %vm1479_vm7, %vm1480_vm5  ;;  %v1659_v37 = vmax.f32 %v1656_v60, 1e-06 }
0x287a   :  { %v1476_v40 = vsub.f32 1.0, %v1475_v39 }
0x287c   :  { %v1477_v41 = vmul.f32 %v2060_v38, %v1476_v40 }
0x287e   :  { %v1478_v44 = vadd.f32 %v2060_v38, %v1477_v41 }
0x2880   :  { %v1482_v20 = vsel %vm1481_vm8, %v2060_v38, %v1478_v44  ;;  %v1600_v44 = vld [vmem:[%s2605_s1 + $0x8] sm:$0xff] }
0x2881   :  { %v1487_v29 = vsel %vm1484_vm9, %v1486_v48, %v1482_v20 }
0x2882   :  { %v1493_v24 = vmul.f32 %v1491_v52, %v1487_v29 }
0x28c7   :  { %v1496_v49 = vpop.permute.xlu2 %1495 }
0x28c8   :  { %v1498_v50 = vmul.f32 %v1496_v49, %v1487_v29 }
0x28ca   :  { %1500 = vrot.lane.b32.xlu0 %v1498_v50, %s2084_s6 }
0x28cf   :  { %v1526_v51 = vpop.permute.xlu2 %1525 }
0x28d0   :  { %1876 = vmatmul.msk.bf16.vlgmr.msrb.gmra.mxu2 %vm88_vm2, %v1526_v51 }
0x293c   :  { %v1501_v6 = vpop.permute.xlu0 %1500 }
0x293d   :  { %v1503_v54 = vadd.f32 %v1501_v6, %v1493_v24 }
0x293f   :  { %2061 = vtanh.f32 %v1503_v54 }
0x2945   :  { %v2062_v53 = vpop.eup %2061 }
0x2946   :  { %1506 = vrot.lane.b32.xlu1 %v2062_v53, %s2083_s4 }
0x2953   :  { %v1556_v55 = vpop.f32.mrf.mxu2 }
0x2954   :  { %v1565_v18 = vsel %vm88_vm2, %v1556_v55, -inf }
0x295b   :  { %v1558_v56 = vpop.f32.mrf.mxu2 }
0x295c   :  { %v1568_v57 = vsel %vm88_vm2, %v1558_v56, -inf }
0x295d   :  { %1569 = vmax.xlane.f32.xlu2 %v1568_v57 }
0x2970   :  { %1566 = vmax.xlane.f32.xlu1 %v1565_v18 }
0x29b8   :  { %v1507_v58 = vpop.permute.xlu1 %1506 }
0x29b9   :  { %v1509_v59 = vmul.f32 %v1507_v58, %v1487_v29  ;;  %v1657_v58 = vld [vmem:[%s2606_s2 + $0x8] sm:$0xff] }
0x29bb   :  { %v1516_v61 = vsel %vm809_vm15, %v1445_v25, %v1509_v59  ;;  %vm1571_vm15 = vcmask 257024   ;;  %v1660_v59 = vmax.f32 %v1657_v58, 1e-06 }
0x29bc   :  { %v1518_v63 = vpack.c.bf16 %v1516_v61, %v1516_v61 }
0x29be   :  { %1527 = vrot.lane.b32.xlu0 %v1518_v63, %s2084_s6 }
0x29d0   :  { %v1570_v1 = vpop.xlane.xlu2 %1569 }
0x29d1   :  { %v2492_v2 = vsub.f32 %v1558_v56, %v1570_v1 }
0x29d3   :  { %v1580_v3 = vmul.f32 1.442695, %v2492_v2 }
0x29d5   :  { %2063 = vpow2.f32 %v1580_v3 }
0x29db   :  { %v2064_v45 = vpop.eup %2063 }
0x29dc   :  { %v1587_v22 = vsel %vm88_vm2, %v2064_v45, 0.0 }
0x29dd   :  { %1588 = vadd.xlane.f32.xlu1 %v1587_v22 }
0x29e3   :  { %v1567_v4 = vpop.xlane.xlu1 %1566 }
0x29e4   :  { %v2496_v5 = vsub.f32 %v1556_v55, %v1567_v4 }
0x29e6   :  { %v1578_v7 = vmul.f32 1.442695, %v2496_v5 }
0x29e8   :  { %2065 = vpow2.f32 %v1578_v7 }
0x29ee   :  { %v2066_v47 = vpop.eup %2065 }
0x29ef   :  { %v1584_v8 = vsel %vm88_vm2, %v2066_v47, 0.0 }
0x29f0   :  { %1585 = vadd.xlane.f32.xlu2 %v1584_v8 }
0x2a30   :  { %v1528_v10 = vpop.permute.xlu0 %1527 }
0x2a31   :  { %1877 = vmatmul.msk.bf16.gmra.mxu2 %vm88_vm2, %v1528_v10 }
0x2a50   :  { %v2513_v14 = vpop.xlane.xlu1 %1588 }
0x2a51   :  { %2067 = vrcp.f32 %v2513_v14 }
0x2a57   :  { %v2068_v16 = vpop.eup %2067 }
0x2a58   :  { %v1638_v17 = vmul.f32 %v2068_v16, %v2064_v45 }
0x2a5a   :  { %v1645_v36 = vmul.f32 %v1902_v15, %v1638_v17 }
0x2a5c   :  { %v1650_v32 = vsel %vm88_vm2, %v1645_v36, 0.0 }
0x2a5d   :  { %1651 = vadd.xlane.f32.xlu1 %v1650_v32 }
0x2a63   :  { %v2520_v19 = vpop.xlane.xlu2 %1585 }
0x2a64   :  { %2069 = vrcp.f32 %v2520_v19 }
0x2a6a   :  { %v2070_v23 = vpop.eup %2069 }
0x2a6b   :  { %v1637_v25 = vmul.f32 %v2070_v23, %v2066_v47 }
0x2a6d   :  { %v1644_v26 = vmul.f32 %v1902_v15, %v1637_v25 }
0x2a6f   :  { %1878 = vmatmul.msk.f32.vlgmr.msra.gmra.mxu3 %vm88_vm2, %v1644_v26  ;;  %v1647_v34 = vsel %vm88_vm2, %v1644_v26, 0.0 }
0x2a77   :  { %1879 = vmatmul.msk.f32.gmra.mxu3 %vm88_vm2, %v1645_v36 }
0x2ab4   :  { %v1561_v33 = vpop.f32.mrf.mxu2 }
0x2ab5   :  { %v1572_v42 = vsel %vm1571_vm15, %v1561_v33, -inf }
0x2ab6   :  { %1573 = vmax.xlane.f32.xlu0 %v1572_v42 }
0x2abc   :  { %v1563_v27 = vpop.f32.mrf.mxu2 }
0x2abe   :  { %1648 = vadd.xlane.f32.xlu0 %v1647_v34 }
0x2ad0   :  { %v1652_v46 = vpop.xlane.xlu1 %1651 }
0x2ad1   :  { %v1663_v61 = vmul.f32 %v1660_v59, %v1652_v46 }
0x2ad2   :  { %1603 = vperm.xlu0 %1897, %v1599_v28  }
0x2ada   :  { %1609 = vperm.xlu0 %1897, %v1601_v30  }
0x2af2   :  { %v1695_v21 = vpop.f32.mrf.mxu3 }
0x2afa   :  { %v1698_v17 = vpop.f32.mrf.mxu3 }
0x2b29   :  { %v1574_v31 = vpop.xlane.xlu0 %1573 }
0x2b2a   :  { %v2533_v11 = vsub.f32 %v1561_v33, %v1574_v31 }
0x2b2c   :  { %v1582_v35 = vmul.f32 1.442695, %v2533_v11 }
0x2b2e   :  { %2071 = vpow2.f32 %v1582_v35 }
0x2b31   :  { %v1649_v38 = vpop.xlane.xlu0 %1648 }
0x2b32   :  { %v1662_v39 = vmul.f32 %v1659_v37, %v1649_v38 }
0x2b34   :  { %v2072_v40 = vpop.eup %2071  ;;  %1706 = vperm.xlu1 %1899, %v1662_v39  }
0x2b35   :  { %v1590_v41 = vsel %vm1571_vm15, %v2072_v40, 0.0 }
0x2b36   :  { %1591 = vadd.xlane.f32.xlu2 %v1590_v41 }
0x2b3c   :  { %1606 = vperm.xlu1 %1899, %v1600_v44  }
0x2b44   :  { %v1604_v63 = vpop.permute.xlu0 %1603 }
0x2b45   :  { %vm1611_vm0 = vcmp.eq.s32.totalorder %v2198_v9, %v1604_v63 }
0x2b46   :  { %v1614_v1 = vsel %vm1611_vm0, %v2496_v5, 0.0 }
0x2b47   :  { %v1617_v3 = vsel %vm88_vm2, %v1614_v1, 0.0 }
0x2b4c   :  { %v1610_v33 = vpop.permute.xlu0 %1609 }
0x2b4d   :  { %vm1613_vm6 = vcmp.eq.s32.totalorder %v2198_v9, %v1610_v33 }
0x2b4e   :  { %v1616_v27 = vsel %vm1613_vm6, %v2533_v11, 0.0 }
0x2b4f   :  { %v1623_v34 = vsel %vm1571_vm15, %v1616_v27, 0.0 }
0x2ba6   :  { %v1707_v20 = vpop.permute.xlu1 %1706 }
0x2ba7   :  { %vm1719_vm10 = vcmp.lt.f32.partialorder %v1695_v21, %v1707_v20 }
0x2ba8   :  { %v1722_v48 = vsel %vm1719_vm10, 1, %v2081_v0 }
0x2ba9   :  { %v1725_v49 = vsel %vm88_vm2, %v1722_v48, 0  ;;  %v2545_v29 = vpop.xlane.xlu2 %1591 }
0x2baa   :  { %v1727_v50 = vshrl.u32 %v1725_v49, 16  ;;  %2073 = vrcp.f32 %v2545_v29  ;;  %v1726_v52 = vand.u32 65535, %v1725_v49 }
0x2bab   :  { %2075 = vlog2.f32 %v2513_v14 }
0x2bac   :  { %v1729_v51 = vcvt.s32.f32 %v1727_v50  ;;  %v1728_v55 = vcvt.s32.f32 %v1726_v52  ;;  %2077 = vlog2.f32 %v2520_v19 }
0x2bad   :  { %2079 = vlog2.f32 %v2545_v29 }
0x2bae   :  { %1732 = vadd.xlane.f32.xlu1 %v1729_v51  ;;  %v1607_v54 = vpop.permute.xlu1 %1606 }
0x2baf   :  { %vm1612_vm11 = vcmp.eq.s32.totalorder %v2198_v9, %v1607_v54 }
0x2bb0   :  { %v2074_v24 = vpop.eup %2073  ;;  %v1615_v57 = vsel %vm1612_vm11, %v2492_v2, 0.0  ;;  %v1658_v2 = vld [vmem:[%s2606_s2 + $0x10] sm:$0xf] }
0x2bb1   :  { %v1639_v6 = vmul.f32 %v2074_v24, %v2072_v40  ;;  %v1620_v18 = vsel %vm88_vm2, %v1615_v57, 0.0  ;;  %v1661_v4 = vmax.f32 %v1658_v2, 1e-06  ;;  %v2076_v12 = vpop.eup %2075 }
0x2bb2   :  { %v1596_v13 = vmul.f32 0.6931472, %v2076_v12  ;;  %v2078_v28 = vpop.eup %2077 }
0x2bb3   :  { %v1646_v53 = vmul.f32 %v1902_v15, %v1639_v6  ;;  %v1594_v30 = vmul.f32 0.6931472, %v2078_v28  ;;  %v2080_v49 = vpop.eup %2079 }
0x2bb5   :  { %1880 = vmatmul.msk.f32.gmra.mxu3 %vm88_vm2, %v1646_v53  ;;  %v1653_v56 = vsel %vm1571_vm15, %v1646_v53, 0.0 }
0x2bb6   :  { %1730 = vadd.xlane.f32.xlu1 %v1728_v55  ;;  %1654 = vadd.xlane.f32.xlu2 %v1653_v56 }
0x2bbe   :  { %1621 = vadd.xlane.f32.xlu1 %v1620_v18 }
0x2bce   :  { %1711 = vperm.xlu2 %1898, %v1663_v61  }
0x2bf7   :  { %1618 = vadd.xlane.f32.xlu2 %v1617_v3 }
0x2c21   :  { %v1733_v45 = vpop.xlane.xlu1 %1732 }
0x2c22   :  { %v1735_v22 = vcvt.f32.s32 %v1733_v45 }
0x2c24   :  { %v1736_v47 = vshll.u32 %v1735_v22, 16 }
0x2c29   :  { %v1731_v7 = vpop.xlane.xlu1 %1730  ;;  %v1655_v8 = vpop.xlane.xlu2 %1654 }
0x2c2a   :  { %v1734_v10 = vcvt.f32.s32 %v1731_v7  ;;  %v1664_v43 = vmul.f32 %v1661_v4, %v1655_v8 }
0x2c2c   :  { %v1737_v62 = vadd.s32 %v1736_v47, %v1734_v10  ;;  %1716 = vperm.xlu0 %1897, %v1664_v43  }
0x2c2e   :  { %vm1764_vm13 = vcmp.lt.s32.totalorder %v1737_v62, 31 }
0x2c2f   :  { %v1765_v5 = vsel %vm1764_vm13, %v1737_v62, 31 }
0x2c30   :  { %1770 = vst.msk [vmem:[%s2607_s13] sm:$0xff] %vm1629_vm12, %v1765_v5 }
0x2c31   :  { %v1622_v15 = vpop.xlane.xlu1 %1621  ;;  %v1712_v16 = vpop.permute.xlu2 %1711 }
0x2c32   :  { %v1627_v14 = vsub.f32 %v1596_v13, %v1622_v15  ;;  %vm1720_vm14 = vcmp.lt.f32.partialorder %v1698_v17, %v1712_v16 }
0x2c33   :  { %v1723_v36 = vsel %vm1720_vm14, 1, %v2081_v0 }
0x2c34   :  { %1631 = vst.msk [vmem:[%s2608_s14 + $0x8] sm:$0xff] %vm1629_vm12, %v1627_v14  ;;  %v1738_v32 = vsel %vm88_vm2, %v1723_v36, 0 }
0x2c35   :  { %v1740_v23 = vshrl.u32 %v1738_v32, 16  ;;  %v1739_v26 = vand.u32 65535, %v1738_v32 }
0x2c37   :  { %v1742_v25 = vcvt.s32.f32 %v1740_v23  ;;  %v1741_v42 = vcvt.s32.f32 %v1739_v26 }
0x2c38   :  { %v1701_v35 = vpop.f32.mrf.mxu3 }
0x2c56   :  { %1745 = vadd.xlane.f32.xlu0 %v1742_v25 }
0x2c5e   :  { %1743 = vadd.xlane.f32.xlu0 %v1741_v42 }
0x2c66   :  { %1624 = vadd.xlane.f32.xlu0 %v1623_v34 }
0x2c6a   :  { %v1619_v31 = vpop.xlane.xlu2 %1618 }
0x2c6b   :  { %v1626_v60 = vsub.f32 %v1594_v30, %v1619_v31 }
0x2c6d   :  { %1630 = vst.msk [vmem:[%s2608_s14] sm:$0xff] %vm1629_vm12, %v1626_v60 }
0x2c9e   :  { %v1717_v37 = vpop.permute.xlu0 %1716 }
0x2c9f   :  { %vm1721_vm2 = vcmp.lt.f32.partialorder %v1701_v35, %v1717_v37 }
0x2ca0   :  { %v1724_v9 = vsel %vm1721_vm2, 1, %v2081_v0  ;;  %v1598_v0 = vmul.f32 0.6931472, %v2080_v49 }
0x2ca1   :  { %v1751_v19 = vsel %vm1571_vm15, %v1724_v9, 0 }
0x2ca2   :  { %v1753_v11 = vshrl.u32 %v1751_v19, 16  ;;  %v1752_v39 = vand.u32 65535, %v1751_v19 }
0x2ca4   :  { %v1755_v38 = vcvt.s32.f32 %v1753_v11  ;;  %v1754_v40 = vcvt.s32.f32 %v1752_v39 }
0x2ca6   :  { %1758 = vadd.xlane.f32.xlu2 %v1755_v38 }
0x2cae   :  { %1756 = vadd.xlane.f32.xlu2 %v1754_v40 }
0x2cc9   :  { %v1746_v41 = vpop.xlane.xlu0 %1745 }
0x2cca   :  { %v1748_v44 = vcvt.f32.s32 %v1746_v41 }
0x2ccc   :  { %v1749_v21 = vshll.u32 %v1748_v44, 16 }
0x2cd1   :  { %v1744_v46 = vpop.xlane.xlu0 %1743 }
0x2cd2   :  { %v1747_v20 = vcvt.f32.s32 %v1744_v46 }
0x2cd4   :  { %v1750_v48 = vadd.s32 %v1749_v21, %v1747_v20 }
0x2cd6   :  { %vm1766_vm1 = vcmp.lt.s32.totalorder %v1750_v48, 31 }
0x2cd7   :  { %v1767_v50 = vsel %vm1766_vm1, %v1750_v48, 31 }
0x2cd8   :  { %1771 = vst.msk [vmem:[%s2607_s13 + $0x8] sm:$0xff] %vm1629_vm12, %v1767_v50 }
0x2cd9   :  { %v1625_v51 = vpop.xlane.xlu0 %1624 }
0x2cda   :  { %v1628_v52 = vsub.f32 %v1598_v0, %v1625_v51 }
0x2cdc   :  { %1633 = vst.msk [vmem:[%s2608_s14 + $0x10] sm:$0xf] %vm1632_vm3, %v1628_v52 }
0x2d19   :  { %v1759_v29 = vpop.xlane.xlu2 %1758 }
0x2d1a   :  { %v1761_v24 = vcvt.f32.s32 %v1759_v29 }
0x2d1c   :  { %v1762_v54 = vshll.u32 %v1761_v24, 16 }
0x2d21   :  { %v1757_v6 = vpop.xlane.xlu2 %1756 }
0x2d22   :  { %v1760_v53 = vcvt.f32.s32 %v1757_v6 }
0x2d24   :  { %v1763_v55 = vadd.s32 %v1762_v54, %v1760_v53 }
0x2d26   :  { %vm1768_vm4 = vcmp.lt.s32.totalorder %v1763_v55, 31 }
0x2d27   :  { %v1769_v56 = vsel %vm1768_vm4, %v1763_v55, 31 }
0x2d28   :  { %1772 = vst.msk [vmem:[%s2607_s13 + $0x10] sm:$0xf] %vm1632_vm3, %v1769_v56 }

</bundles_post_ra>
